<compile_context>
chip_gen: v7x
topology: tpu7x:2x2x1
jax: 0.10.0
libtpu: 0.0.40
codegen_flags: <defaults>
</compile_context>

<pallas_src>
import jax
import jax.numpy as jnp
from jax.experimental import pallas as pl
from jax.experimental.pallas import tpu as pltpu


def _round_up(x, m):
    return (x + m - 1) // m * m


def mlp_kernel(x_ref, w1_ref, b1_ref, w2_ref, b2_ref, o_ref, acc_ref):
    # grid = (row_tiles, h_tiles); axis 1 is a reduction over the hidden dim.
    k = pl.program_id(1)

    @pl.when(k == 0)
    def _init():
        acc_ref[...] = jnp.zeros_like(acc_ref)

    # fc1 chunk on the MXU: (tm, C_in) @ (C_in, th) -> f32 (tm, th)
    h = jnp.dot(x_ref[...], w1_ref[...], preferred_element_type=jnp.float32)
    h = h + b1_ref[...]                      # b1 chunk, f32, once per H-chunk

    # exact erf-GELU (matches torch.nn.GELU default), kept in f32
    h = 0.5 * h * (1.0 + jax.lax.erf(h * 0.7071067811865476))

    # dropout p=0.0 is identity -> skipped

    # fc2 chunk: feed the MXU in the weights' dtype (bf16 when requested),
    # accumulate in the f32 VMEM scratch.
    acc_ref[...] += jnp.dot(
        h.astype(w2_ref.dtype), w2_ref[...], preferred_element_type=jnp.float32
    )

    @pl.when(k == pl.num_programs(1) - 1)
    def _finalize():
        o_ref[...] = (acc_ref[...] + b2_ref[...]).astype(o_ref.dtype)


def mlp_pallas(x, w1, b1, w2, b2, *, tm=256, th=512, compute_dtype=None):
    """x: (B, N, C_in); w1: (C_in, H); b1: (H,); w2: (H, C_out); b2: (C_out,).

    Weights are stored pre-transposed vs. torch nn.Linear so the kernel does
    plain row-major matmuls on the MXU.
    """
    orig_dtype = x.dtype
    if compute_dtype is None:
        compute_dtype = orig_dtype

    B, N, C_in = x.shape
    H = w1.shape[1]
    C_out = w2.shape[1]
    M = B * N

    # Clamp tiles to the (padded) problem size.
    th = min(th, _round_up(H, 128))
    tm = min(tm, _round_up(M, 8))
    M_pad = _round_up(M, tm)
    H_pad = _round_up(H, th)

    # Inputs: cast MXU feeds to compute_dtype, keep biases in f32.
    x2d = x.reshape(M, C_in).astype(compute_dtype)
    if M_pad != M:
        x2d = jnp.pad(x2d, ((0, M_pad - M), (0, 0)))
    w1c = w1.astype(compute_dtype)
    w2c = w2.astype(compute_dtype)
    b1f = b1.astype(jnp.float32).reshape(1, H)
    b2f = b2.astype(jnp.float32).reshape(1, C_out)
    if H_pad != H:
        # Zero-padded hidden columns give GELU(0)=0 and zero w2 rows, so they
        # contribute nothing to the output.
        w1c = jnp.pad(w1c, ((0, 0), (0, H_pad - H)))
        b1f = jnp.pad(b1f, ((0, 0), (0, H_pad - H)))
        w2c = jnp.pad(w2c, ((0, H_pad - H), (0, 0)))

    grid = (M_pad // tm, H_pad // th)

    # Explicit VMEM budget (double-buffered tiles + f32 scratch + intermediate).
    isz = jnp.dtype(compute_dtype).itemsize
    vmem_bytes = (
        2 * tm * C_in * isz          # x tiles
        + 2 * C_in * th * isz        # w1 tiles
        + 2 * th * C_out * isz       # w2 tiles
        + 2 * (th + C_out) * 4       # bias tiles
        + 2 * tm * C_out * isz       # out tiles
        + tm * C_out * 4             # f32 accumulator scratch
        + tm * th * 4                # f32 fc1/GELU intermediate
    )
    vmem_limit = int(min(100 * 2**20, max(32 * 2**20, 2 * vmem_bytes)))

    cost = pl.CostEstimate(
        flops=2 * M * H * (C_in + C_out),
        transcendentals=M * H,
        bytes_accessed=(M * C_in + C_in * H + H * C_out + M * C_out) * isz
        + (H + C_out) * 4,
    )

    out2d = pl.pallas_call(
        mlp_kernel,
        out_shape=jax.ShapeDtypeStruct((M_pad, C_out), orig_dtype),
        grid_spec=pltpu.PrefetchScalarGridSpec(
            num_scalar_prefetch=0,
            grid=grid,
            in_specs=[
                pl.BlockSpec((tm, C_in), lambda i, k: (i, 0)),    # x row tile
                pl.BlockSpec((C_in, th), lambda i, k: (0, k)),    # w1 H-chunk
                pl.BlockSpec((1, th), lambda i, k: (0, k)),       # b1 H-chunk
                pl.BlockSpec((th, C_out), lambda i, k: (k, 0)),   # w2 H-chunk
                pl.BlockSpec((1, C_out), lambda i, k: (0, 0)),    # b2
            ],
            out_specs=pl.BlockSpec((tm, C_out), lambda i, k: (i, 0)),
            scratch_shapes=[pltpu.VMEM((tm, C_out), jnp.float32)],
        ),
        compiler_params=pltpu.CompilerParams(
            dimension_semantics=("parallel", "arbitrary"),
            vmem_limit_bytes=vmem_limit,
        ),
        cost_estimate=cost,
    )(x2d, w1c, b1f, w2c, b2f)

    return out2d[:M].reshape(B, N, C_out)


def mlp_reference(x, w1, b1, w2, b2):
    hp = jax.lax.Precision.HIGHEST
    h = jnp.einsum("bnc,ch->bnh", x, w1, precision=hp) + b1
    h = 0.5 * h * (1.0 + jax.lax.erf(h / jnp.sqrt(2.0)))
    return jnp.einsum("bnh,ho->bno", h, w2, precision=hp) + b2


if __name__ == "__main__":
    # Small but lane-dense shapes (feature dims multiples of 128); N chosen so
    # that M = B*N = 200 exercises the row-padding path.
    B, N = 2, 100
    in_features = 128
    hidden_features = 512
    out_features = 128

    key = jax.random.PRNGKey(0)
    kx, k1, kb1, k2, kb2 = jax.random.split(key, 5)

    x = jax.random.normal(kx, (B, N, in_features), dtype=jnp.float32)
    w1 = jax.random.normal(k1, (in_features, hidden_features), jnp.float32) * 0.05
    b1 = jax.random.normal(kb1, (hidden_features,), jnp.float32) * 0.01
    w2 = jax.random.normal(k2, (hidden_features, out_features), jnp.float32) * 0.05
    b2 = jax.random.normal(kb2, (out_features,), jnp.float32) * 0.01

    ref = mlp_reference(x, w1, b1, w2, b2)

    # f32 path: tm=128 / th=256 exercises both grid axes (2 row tiles, 2 H steps).
    out = mlp_pallas(x, w1, b1, w2, b2, tm=128, th=256)
    out = jax.block_until_ready(out)
    assert out.shape == (B, N, out_features)
    assert jnp.allclose(out, ref, atol=1e-3, rtol=1e-3), "f32 mismatch vs reference"

    # bf16 MXU-feed path (f32 GELU + f32 accumulation), looser tolerance.
    out_bf16 = mlp_pallas(x, w1, b1, w2, b2, tm=128, th=256,
                          compute_dtype=jnp.bfloat16)
    out_bf16 = jax.block_until_ready(out_bf16)
    assert jnp.allclose(out_bf16, ref, atol=5e-2, rtol=5e-2), "bf16 mismatch vs reference"

    print("KERNEL_OK")
</pallas_src>

<mosaic_0001>
module attributes {stable_mosaic.version = 11 : i64} {
  func.func @mlp_kernel(%arg0: i32, %arg1: i32, %arg2: memref<128x128xf32, #tpu.memory_space<vmem>>, %arg3: memref<128x256xf32, #tpu.memory_space<vmem>>, %arg4: memref<1x256xf32, #tpu.memory_space<vmem>>, %arg5: memref<256x128xf32, #tpu.memory_space<vmem>>, %arg6: memref<1x128xf32, #tpu.memory_space<vmem>>, %arg7: memref<128x128xf32, #tpu.memory_space<vmem>>, %arg8: memref<128x128xf32, #tpu.memory_space<vmem>>) attributes {dimension_semantics = [#tpu.dimension_semantics<parallel>, #tpu.dimension_semantics<arbitrary>], iteration_bounds = array<i64: 2, 2>, scalar_prefetch = 0 : i64, scratch_operands = 1 : i64, tpu.core_type = #tpu.core_type<tc>, window_params = [{transform_indices = @transform_0, window_bounds = array<i64: 128, 128>}, {transform_indices = @transform_1, window_bounds = array<i64: 128, 256>}, {transform_indices = @transform_2, window_bounds = array<i64: 1, 256>}, {transform_indices = @transform_3, window_bounds = array<i64: 256, 128>}, {pipeline_mode = #tpu.pipeline_mode<synchronous>, transform_indices = @transform_4, window_bounds = array<i64: 1, 128>}, {transform_indices = @transform_5, window_bounds = array<i64: 128, 128>}]} {
    %c0_i32 = arith.constant 0 : i32
    %0 = arith.cmpi eq, %arg1, %c0_i32 : i32
    %1 = arith.extui %0 : i1 to i32
    %c0_i32_0 = arith.constant 0 : i32
    %2 = arith.cmpi ne, %1, %c0_i32_0 : i32
    scf.if %2 {
      %cst_17 = arith.constant 0.000000e+00 : f32
      %25 = vector.broadcast %cst_17 : f32 to vector<128x128xf32>
      %c0_18 = arith.constant 0 : index
      %c0_19 = arith.constant 0 : index
      %26 = vector.load %arg8[%c0_18, %c0_19] : memref<128x128xf32, #tpu.memory_space<vmem>>, vector<128x128xf32>
      tpu.vector_store %arg8[%c0_18, %c0_19], %25 {strides = array<i32>} : memref<128x128xf32, #tpu.memory_space<vmem>>, vector<128x128xf32>,
    } else {
    }
    %c0 = arith.constant 0 : index
    %c0_1 = arith.constant 0 : index
    %3 = vector.load %arg2[%c0, %c0_1] : memref<128x128xf32, #tpu.memory_space<vmem>>, vector<128x128xf32>
    %c0_2 = arith.constant 0 : index
    %c0_3 = arith.constant 0 : index
    %4 = vector.load %arg3[%c0_2, %c0_3] : memref<128x256xf32, #tpu.memory_space<vmem>>, vector<128x256xf32>
    %cst = arith.constant dense<0.000000e+00> : vector<128x256xf32>
    %5 = tpu.matmul %3, %4, %cst {dimension_numbers = #tpu.dot_dimension_numbers<[1], [0], [0], [1], [0, 0, 1, 1], [], []>} : vector<128x128xf32>, vector<128x256xf32>, vector<128x256xf32> -> vector<128x256xf32>
    %c0_4 = arith.constant 0 : index
    %c0_5 = arith.constant 0 : index
    %6 = vector.load %arg4[%c0_4, %c0_5] : memref<1x256xf32, #tpu.memory_space<vmem>>, vector<1x256xf32>
    %7 = vector.broadcast %6 : vector<1x256xf32> to vector<128x256xf32>
    %8 = arith.addf %5, %7 : vector<128x256xf32>
    %cst_6 = arith.constant 5.000000e-01 : f32
    %9 = vector.broadcast %cst_6 : f32 to vector<128x256xf32>
    %10 = arith.mulf %9, %8 : vector<128x256xf32>
    %cst_7 = arith.constant 0.707106769 : f32
    %11 = vector.broadcast %cst_7 : f32 to vector<128x256xf32>
    %12 = arith.mulf %8, %11 : vector<128x256xf32>
    %13 = math.erf %12 : vector<128x256xf32>
    %cst_8 = arith.constant 1.000000e+00 : f32
    %14 = vector.broadcast %cst_8 : f32 to vector<128x256xf32>
    %15 = arith.addf %14, %13 : vector<128x256xf32>
    %16 = arith.mulf %10, %15 : vector<128x256xf32>
    %c0_9 = arith.constant 0 : index
    %c0_10 = arith.constant 0 : index
    %17 = vector.load %arg8[%c0_9, %c0_10] : memref<128x128xf32, #tpu.memory_space<vmem>>, vector<128x128xf32>
    %c0_11 = arith.constant 0 : index
    %c0_12 = arith.constant 0 : index
    %18 = vector.load %arg5[%c0_11, %c0_12] : memref<256x128xf32, #tpu.memory_space<vmem>>, vector<256x128xf32>
    %cst_13 = arith.constant dense<0.000000e+00> : vector<128x128xf32>
    %19 = tpu.matmul %16, %18, %cst_13 {dimension_numbers = #tpu.dot_dimension_numbers<[1], [0], [0], [1], [0, 0, 1, 1], [], []>} : vector<128x256xf32>, vector<256x128xf32>, vector<128x128xf32> -> vector<128x128xf32>
    %20 = arith.addf %17, %19 : vector<128x128xf32>
    %c0_14 = arith.constant 0 : index
    %c0_15 = arith.constant 0 : index
    %21 = vector.load %arg8[%c0_14, %c0_15] : memref<128x128xf32, #tpu.memory_space<vmem>>, vector<128x128xf32>
    tpu.vector_store %arg8[%c0_14, %c0_15], %20 {strides = array<i32>} : memref<128x128xf32, #tpu.memory_space<vmem>>, vector<128x128xf32>,
    %c1_i32 = arith.constant 1 : i32
    %22 = arith.cmpi eq, %arg1, %c1_i32 : i32
    %23 = arith.extui %22 : i1 to i32
    %c0_i32_16 = arith.constant 0 : i32
    %24 = arith.cmpi ne, %23, %c0_i32_16 : i32
    scf.if %24 {
      %c0_17 = arith.constant 0 : index
      %c0_18 = arith.constant 0 : index
      %25 = vector.load %arg8[%c0_17, %c0_18] : memref<128x128xf32, #tpu.memory_space<vmem>>, vector<128x128xf32>
      %c0_19 = arith.constant 0 : index
      %c0_20 = arith.constant 0 : index
      %26 = vector.load %arg6[%c0_19, %c0_20] : memref<1x128xf32, #tpu.memory_space<vmem>>, vector<1x128xf32>
      %27 = vector.broadcast %26 : vector<1x128xf32> to vector<128x128xf32>
      %28 = arith.addf %25, %27 : vector<128x128xf32>
      %c0_21 = arith.constant 0 : index
      %c0_22 = arith.constant 0 : index
      %29 = vector.load %arg7[%c0_21, %c0_22] : memref<128x128xf32, #tpu.memory_space<vmem>>, vector<128x128xf32>
      tpu.vector_store %arg7[%c0_21, %c0_22], %28 {strides = array<i32>} : memref<128x128xf32, #tpu.memory_space<vmem>>, vector<128x128xf32>,
    } else {
    }
    return
  }
  func.func @transform_0(%arg0: i32, %arg1: i32) -> (i32, i32) {
    %c0_i32 = arith.constant 0 : i32
    %c0_i32_0 = arith.constant 0 : i32
    return %arg0, %c0_i32 : i32, i32
  }
  func.func @transform_1(%arg0: i32, %arg1: i32) -> (i32, i32) {
    %c0_i32 = arith.constant 0 : i32
    %c0_i32_0 = arith.constant 0 : i32
    return %c0_i32, %arg1 : i32, i32
  }
  func.func @transform_2(%arg0: i32, %arg1: i32) -> (i32, i32) {
    %c0_i32 = arith.constant 0 : i32
    %c0_i32_0 = arith.constant 0 : i32
    return %c0_i32, %arg1 : i32, i32
  }
  func.func @transform_3(%arg0: i32, %arg1: i32) -> (i32, i32) {
    %c0_i32 = arith.constant 0 : i32
    %c0_i32_0 = arith.constant 0 : i32
    return %arg1, %c0_i32 : i32, i32
  }
  func.func @transform_4(%arg0: i32, %arg1: i32) -> (i32, i32) {
    %c0_i32 = arith.constant 0 : i32
    %c0_i32_0 = arith.constant 0 : i32
    %c0_i32_1 = arith.constant 0 : i32
    return %c0_i32, %c0_i32_0 : i32, i32
  }
  func.func @transform_5(%arg0: i32, %arg1: i32) -> (i32, i32) {
    %c0_i32 = arith.constant 0 : i32
    %c0_i32_0 = arith.constant 0 : i32
    return %arg0, %c0_i32 : i32, i32
  }
}

</mosaic_0001>

<bundles_post_ra>
// kernel: tpu_custom_call.1
= control target key start
LH: loop header
LB: loop body
LE: loop exit
PB: predicated region body
PF: predicated region fallthrough
CT: control target
= control target key end

     0   :  { %s2421_s0 = inlined_call_operand.hbm [shape: f32[256,128], index: 0, kind: input, shape index: {}]   ;;  %s2422_s1 = inlined_call_operand.hbm [shape: f32[128,512], index: 1, kind: input, shape index: {}]   ;;  %s2423_s2 = inlined_call_operand.vmem [shape: f32[1,512], index: 2, kind: input, shape index: {}]   ;;  %s2424_s3 = inlined_call_operand.hbm [shape: f32[512,128], index: 3, kind: input, shape index: {}]   ;;  %s2425_s4 = inlined_call_operand.vmem [shape: f32[1,128], index: 4, kind: input, shape index: {}]   ;;  %s2426_s5 = inlined_call_operand.hbm [shape: f32[256,128], index: 5, kind: output, shape index: {}]  }
   0x1   :  { %2439 = sst [smem:[#allocation21_spill]] %s2422_s1 }
   0x2   :  { %2440 = sst [smem:[#allocation22_spill]] %s2425_s4 }
   0x3   :  { %2441 = sst [smem:[#allocation23_spill]] %s2426_s5 }
   0x4   :  { %10 = vsyncpa [#allocation4], 0 }
   0x5   :  { %12 = vsyncpa [#allocation4 + $0x1], 0 }
   0x6   :  { %13 = vsyncpa [#allocation7], 0 }
   0x7   :  { %15 = vsyncpa [#allocation7 + $0x1], 0 }
   0x8   :  { %16 = vsyncpa [#allocation5], 0 }
   0x9   :  { %18 = vsyncpa [#allocation5 + $0x1], 0  ;;  %s1811_s18 = smov 0   ;;  %s1813_s19 = smov 0  }
   0xa   :  { %s1815_s20 = smov 0   ;;  %s1817_s21 = smov 0  }
   0xb   :  { %s1819_s22 = smov 0   ;;  %s1821_s23 = smov 0  }
   0xc   :  { %s1823_s24 = smov 0   ;;  %s1825_s25 = smov 0  }
   0xd   :  { %s1827_s26 = smov 0   ;;  %s1829_s27 = smov 0  }
   0xe   :  { %s1831_s28 = smov 0  }
   0xf LB: > { %2442 = sst [smem:[#allocation13_spill]] %s1734_s20  ;;  %s33_s29 = sadd.s32 1, %s1758_s26  ;;  %s1766_s28 = sphi %s1831_s28, %s24_s28   ;;  %s1762_s27 = sphi %s1829_s27, %s2480_s27   ;;  %s1758_s26 = sphi %s1827_s26, %s2486_s26   ;;  %s1754_s25 = sphi %s1825_s25, %s2478_s25   ;;  %s1750_s24 = sphi %s1823_s24, %s2485_s24   ;;  %s1746_s23 = sphi %s1821_s23, %s2477_s23   ;;  %s1742_s22 = sphi %s1819_s22, %s2484_s22   ;;  %s1738_s21 = sphi %s1817_s21, %s2483_s21   ;;  %s1734_s20 = sphi %s1815_s20, %s2475_s20   ;;  %s1730_s19 = sphi %s1813_s19, %s2482_s19   ;;  %s1726_s18 = sphi %s1811_s18, %s2481_s18  }
  0x10   : > { %2443 = sst [smem:[#allocation14_spill]] %s1746_s23  ;;  %p2429_p0 = scmp.eq.s32.totalorder %s1766_s28, 0 }
  0x11   : > { %2444 = sst [smem:[#allocation15_spill]] %s1754_s25  ;;  %p1868_p1 = scmp.ge.s32.totalorder %s33_s29, 2 }
  0x12   : > { %2445 = sst [smem:[#allocation16_spill]] %s1762_s27  ;;  %s69_s6 = sadd.s32 1, %s1734_s20 }
  0x13   : > { %p76_p2 = scmp.ne.s32.totalorder %s1734_s20, %s1730_s19  ;;  %s2488_s29 = smov (%p1868_p1, %s33_s29), 0 }
  0x14   : > { %2447 = sst [smem:[#allocation17_spill]] %s2488_s29  ;;  %s66_s7 = ssub.s32 %s1758_s26, %s2488_s29 }
  0x15   : > { %p78_p4 = por %p76_p2, %p2429_p0  ;;  %p2428_p5 = scmp.lt.s32.totalorder %s1766_s28, 4 }
  0x16   : > { %p67_p6 = scmp.eq.s32.totalorder %s66_s7, 0  ;;  %s229_s8 = sand.u32 1, %s1766_s28  }
  0x17   : > { %s231_s9 = sand.u32 1, %s1734_s20   ;;  %s1218_s12 = sshll.u32 %s1758_s26, 8 }
  0x18   : > { %s1889_s10 = scalar_select %p67_p6, %s1734_s20, %s69_s6  }
  0x19   : > { %s1891_s11 = sshll.u32 %s231_s9, 8  ;;  %s2449_s1 = sld [smem:[#allocation21_spill]] }
  0x1a   : > { %2448 = sst [smem:[#allocation18_spill]] %s1889_s10  ;;  %s233_s16 = scalar_lea.vmem [#allocation6], %s1891_s11 }
  0x1b   : > { %s240_s17 = sshll.u32 %s233_s16, 4  ;;  %p1902_p7 = pnand %p2428_p5, %p78_p4  ;;  %s1906_s17 = int_to_ptr.vmem [resolvable:$true] %s240_s17 }
  0x1c   : > { %s1909_s6 = scalar_lea.sflag [#allocation7], %s229_s8 }
  0x1d   : > { %p2430_p10 = pneg %p1902_p7 }
  0x1f   : > { %s1897_s15 = scalar_lea.hbm %s2449_s1, %s1218_s12  ;;  %s1555_s14 = scalar_lea.hbm %s2449_s1, 8192 }
  0x20   : > { %s1550_s9 = scalar_lea.hbm %s1897_s15, 4096  ;;  %p1556_p13 = scmp.lt.u32.totalorder %s1897_s15, %s2449_s1 }
  0x21   : > { %p1551_p9 = scmp.ne.s32.totalorder %s1897_s15, %s1550_s9  ;;  %p1557_p2 = scmp.lt.u32.totalorder %s1555_s14, %s1550_s9 }
  0x22   : > { %p1559_p6 = scmp.lt.u32.totalorder %s1550_s9, %s1897_s15 }
  0x23   : > { %p1553_p11 = pnand %p2430_p10, %p1551_p9  ;;  %p1558_p4 = por %p1557_p2, %p1556_p13 }
  0x25   : > { %p1554_p12 = pneg %p1553_p11  ;;  %p1560_p5 = por %p1559_p6, %p1558_p4 }
  0x27   : > { %p1561_p3 = pnand %p1560_p5, %p1554_p12 }
  0x29   : > { %1564 = shalt.err (!%p1561_p3)
}
  0x2a   : > { %s1565_s8 = scalar_lea.vmem %s1906_s17, 4096  ;;  %s1768_s12 = smov [#allocation6]  }
  0x2b   : > { %p1566_p9 = scmp.ne.s32.totalorder %s1906_s17, %s1565_s8  ;;  %s1570_s13 = sshll.u32 %s1768_s12, 4  ;;  %s1571_s13 = int_to_ptr.vmem [resolvable:$false] %s1570_s13 }
  0x2c   : > { %s1572_s29 = scalar_lea.vmem %s1571_s13, 8192  ;;  %p1573_p8 = scmp.lt.s32.totalorder %s1906_s17, %s1571_s13 }
  0x2d   : > { %p1568_p11 = pnand %p1566_p9, %p2430_p10  ;;  %p1574_p13 = scmp.lt.s32.totalorder %s1572_s29, %s1565_s8 }
  0x2f   : > { %p1569_p0 = pneg %p1568_p11  ;;  %p1575_p2 = por %p1574_p13, %p1573_p8 }
  0x31   : > { %p1576_p4 = pnand %p1575_p2, %p1569_p0 }
  0x33   : > { %1579 = shalt.err (!%p1576_p4)
}
  0x34   : > { %s1769_s9 = smov 512   ;;  %s1770_s14 = smov 256  }
  0x35   : > { %s1771_s16 = smov 16   ;;  %p277_p0 = scmp.lt.s32.totalorder %s1766_s28, 5 }
  0x36   : > { %1379 = dma.hbm_to_vmem [thread:$0]  (!%p1902_p7), %s1897_s15, 4096, %s1906_s17, %s1909_s6, %s1769_s9, %s1770_s14, %s1771_s16  }
  0x37   : > { %p2451_p3 = scmp.ge.s32.totalorder %s1766_s28, 1  ;;  %s1945_s12 = sadd.s32 4294967295, %s1766_s28  }
  0x38   : > { %s1191_s13 = sadd.s32 4294967294, %s1766_s28   ;;  %s36_s29 = sadd.s32 1, %s1762_s27 }
  0x39   : > { %p1940_p5 = pnand %p2451_p3, %p277_p0  ;;  %s43_s1 = sadd.s32 1, %s1746_s23 }
  0x3a   : > { %s2490_s29 = smov (!%p1868_p1, %s36_s29), %s1762_s27  ;;  %p50_p8 = scmp.ne.s32.totalorder %s1746_s23, %s1742_s22 }
  0x3b   : > { %s2452_s8 = scalar_select %p1940_p5, 1, 0 }
  0x3c   : > { %p56_p12 = scmp.ne.s32.totalorder %s1742_s22, %s1738_s21  ;;  %p38_p6 = scmp.ge.s32.totalorder %s2490_s29, 2 }
  0x3d   : > { %p57_p9 = scmp.eq.s32.totalorder %s1945_s12, 0  ;;  %p2453_p11 = scmp.eq.s32.totalorder %s1766_s28, 0 }
  0x3e   : > { %p179_p2 = scmp.eq.s32.totalorder %s1945_s12, 3  ;;  %s2492_s29 = smov (%p38_p6, %s2490_s29), 0 }
  0x3f   : > { %p1960_p13 = por %p2453_p11, %p50_p8  ;;  %2455 = sst [smem:[#allocation19_spill]] %s2492_s29 }
  0x40   : > { %p1970_p1 = por %p57_p9, %p56_p12  ;;  %p2457_p4 = scmp.ne.s32.totalorder %s1730_s19, %s1726_s18 }
  0x41   : > { %s40_s9 = ssub.s32 %s1762_s27, %s2492_s29  ;;  %p1983_p3 = por %p179_p2, %p50_p8 }
  0x42   : > { %s2456_s30 = scalar_select %p1970_p1, 1, 0 }
  0x43   : > { %p1977_p0 = por %p2457_p4, %p57_p9  ;;  %p41_p11 = scmp.eq.s32.totalorder %s40_s9, 0 }
  0x44   : > { %s2459_s14 = scalar_select %p1983_p3, 1, 0 }
  0x45   : > { %s2458_s17 = scalar_select %p1977_p0, 1, 0 }
  0x46   : > { %p185_p10 = scmp.eq.s32.totalorder %s1191_s13, 3  ;;  %s208_s16 = sand.u32 1, %s1746_s23  }
  0x47   : > { %s1217_s10 = sshll.u32 %s1762_s27, 11  ;;  %s1194_s18 = sshll.u32 %s208_s16, 7 }
  0x48   : > { %s1990_s20 = scalar_select %p41_p11, %s1746_s23, %s43_s1  }
  0x49   : > { %p1995_p6 = por %p185_p10, %p56_p12  ;;  %s2002_s29 = scalar_lea.hbm %s2421_s0, %s1217_s10 }
  0x4a   : > { %2460 = sst [smem:[#allocation20_spill]] %s1990_s20  ;;  %p2462_p8 = scmp.lt.s32.totalorder %s1766_s28, 4 }
  0x4b   : > { %s2461_s5 = scalar_select %p1995_p6, 1, 0 }
  0x4c   : > { %p2008_p9 = pnand %p2462_p8, %p1960_p13  ;;  %s212_s13 = scalar_lea.vmem [#allocation3], %s1194_s18 }
  0x4d   : > { %s219_s9 = sshll.u32 %s212_s13, 4  ;;  %s2014_s27 = scalar_lea.sflag [#allocation4], %s208_s16  ;;  %s2012_s9 = int_to_ptr.vmem [resolvable:$true] %s219_s9 }
  0x4e   : > { %s1580_s4 = scalar_lea.hbm %s2002_s29, 2048  ;;  %p1582_p12 = pneg %p2008_p9 }
  0x4f   : > { %p1581_p10 = scmp.ne.s32.totalorder %s2002_s29, %s1580_s4  ;;  %s1585_s15 = scalar_lea.hbm %s2421_s0, 4096 }
  0x50   : > { %p1586_p13 = scmp.lt.u32.totalorder %s2002_s29, %s2421_s0  ;;  %p1587_p11 = scmp.lt.u32.totalorder %s1585_s15, %s1580_s4 }
  0x51   : > { %p1583_p2 = pnand %p1582_p12, %p1581_p10  ;;  %p1589_p6 = scmp.lt.u32.totalorder %s1580_s4, %s2002_s29 }
  0x52   : > { %p1588_p8 = por %p1587_p11, %p1586_p13 }
  0x53   : > { %p1584_p4 = pneg %p1583_p2 }
  0x54   : > { %p1590_p3 = por %p1589_p6, %p1588_p8 }
  0x56   : > { %p1591_p0 = pnand %p1590_p3, %p1584_p4 }
  0x58   : > { %1594 = shalt.err (!%p1591_p0)
}
  0x59   : > { %s1595_s16 = scalar_lea.vmem %s2012_s9, 2048  ;;  %s1772_s18 = smov [#allocation3]  }
  0x5a   : > { %p1596_p10 = scmp.ne.s32.totalorder %s2012_s9, %s1595_s16  ;;  %s1600_s13 = sshll.u32 %s1772_s18, 4  ;;  %s1601_s13 = int_to_ptr.vmem [resolvable:$false] %s1600_s13 }
  0x5b   : > { %s1602_s20 = scalar_lea.vmem %s1601_s13, 4096  ;;  %p1603_p5 = scmp.lt.s32.totalorder %s2012_s9, %s1601_s13 }
  0x5c   : > { %p1598_p2 = pnand %p1596_p10, %p1582_p12  ;;  %p1604_p13 = scmp.lt.s32.totalorder %s1602_s20, %s1595_s16 }
  0x5e   : > { %p1599_p1 = pneg %p1598_p2  ;;  %p1605_p11 = por %p1604_p13, %p1603_p5 }
  0x60   : > { %p1606_p6 = pnand %p1605_p11, %p1599_p1 }
  0x62   : > { %1609 = shalt.err (!%p1606_p6)
}
  0x63   : > { %s1773_s23 = smov 128   ;;  %s1774_s4 = smov 8  }
  0x64   : > { %1376 = dma.hbm_to_vmem [thread:$0]  (!%p2008_p9), %s2002_s29, 2048, %s2012_s9, %s2014_s27, %s1773_s23, %s1773_s23, %s1774_s4  }
  0x65   : > { %s1219_s25 = sshll.u32 %s1758_s26, 12  ;;  %s262_s10 = scalar_lea.vmem [#allocation8], %s1891_s11 }
  0x66   : > { %s269_s15 = sshll.u32 %s262_s10, 4  ;;  %s2050_s13 = scalar_lea.hbm %s2424_s3, %s1219_s25  ;;  %s2052_s15 = int_to_ptr.vmem [resolvable:$true] %s269_s15 }
  0x67   : > { %s1610_s20 = scalar_lea.hbm %s2050_s13, 4096  ;;  %p2464_p1 = pneg %p1902_p7 }
  0x68   : > { %p1611_p5 = scmp.ne.s32.totalorder %s2050_s13, %s1610_s20  ;;  %s1615_s29 = scalar_lea.hbm %s2424_s3, 8192 }
  0x69   : > { %p1616_p9 = scmp.lt.u32.totalorder %s2050_s13, %s2424_s3  ;;  %p1617_p12 = scmp.lt.u32.totalorder %s1615_s29, %s1610_s20 }
  0x6a   : > { %p1613_p0 = pnand %p1611_p5, %p2464_p1  ;;  %p1619_p8 = scmp.lt.u32.totalorder %s1610_s20, %s2050_s13 }
  0x6b   : > { %p1618_p4 = por %p1617_p12, %p1616_p9 }
  0x6c   : > { %p1614_p3 = pneg %p1613_p0 }
  0x6d   : > { %p1620_p10 = por %p1619_p8, %p1618_p4 }
  0x6f   : > { %p1621_p2 = pnand %p1620_p10, %p1614_p3 }
  0x71   : > { %1624 = shalt.err (!%p1621_p2)
}
  0x72   : > { %s1625_s25 = scalar_lea.vmem %s2052_s15, 4096  ;;  %p2465_p11 = pmov %p2464_p1 }
  0x73   : > { %p1626_p13 = scmp.ne.s32.totalorder %s2052_s15, %s1625_s25  ;;  %s1775_s10 = smov [#allocation8]  }
  0x74   : > { %s1630_s16 = sshll.u32 %s1775_s10, 4  ;;  %s1631_s16 = int_to_ptr.vmem [resolvable:$false] %s1630_s16 }
  0x75   : > { %p1628_p6 = pnand %p1626_p13, %p2465_p11  ;;  %s1632_s18 = scalar_lea.vmem %s1631_s16, 8192 }
  0x76   : > { %p1633_p1 = scmp.lt.s32.totalorder %s2052_s15, %s1631_s16  ;;  %p1634_p0 = scmp.lt.s32.totalorder %s1632_s18, %s1625_s25 }
  0x77   : > { %p1629_p5 = pneg %p1628_p6 }
  0x78   : > { %p1635_p9 = por %p1634_p0, %p1633_p1 }
  0x7a   : > { %p1636_p12 = pnand %p1635_p9, %p1629_p5 }
  0x7c   : > { %1639 = shalt.err (!%p1636_p12)
}
  0x7d   : > { %1382 = dma.hbm_to_vmem [thread:$0]  (!%p1902_p7), %s2050_s13, 4096, %s2052_s15, %s1909_s6, %s1773_s23, %s1773_s23, %s1774_s4  }
  0x7e   : > { %p2466_p3 = scmp.ne.s32.totalorder %s2452_s8, 0 }
  0x7f   : > { %s2084_s20 = sand.u32 (!%p2466_p3), 1, %s1742_s22   ;;  %p2467_p4 = scmp.ne.s32.totalorder (!%p2466_p3), %s2456_s30, 0 }
  0x80   : > { %281 = sbr.rel (%p2466_p3) target bundleno = 737 (0x2e1), region = 40  ;;  %s1204_s27 = sshll.u32 (!%p2466_p3), %s2084_s20, 7 }
  0x81   : > { %s284_s11 = scalar_lea.sflag (!%p2466_p3), [#allocation4], %s2084_s20  ;;  %s2088_s29 = scalar_lea.vmem (!%p2466_p3), [#allocation3], %s1204_s27 }
  0x87   : > { %1713 = dma.done.wait (%p2467_p4), %s284_s11, 2048  }
  0x88   : > { %1715 = vsyncadd (%p2467_p4), %s284_s11, 4294965248  ;;  %s292_s7 = sand.u32 1, %s1945_s12   ;;  %s294_s6 = sand.u32 1, %s1730_s19  }
  0x89   : > { %s1205_s8 = sshll.u32 %s294_s6, 8  ;;  %s293_s23 = scalar_lea.sflag [#allocation7], %s292_s7 }
  0x8a   : > { %s2096_s4 = scalar_lea.vmem [#allocation6], %s1205_s8  ;;  %p2468_p7 = scmp.ne.s32.totalorder %s2458_s17, 0 }
  0x8c   : > { %1717 = dma.done.wait (%p2468_p7), %s293_s23, 8192  }
  0x8d   : > { %1719 = vsyncadd (%p2468_p7), %s293_s23, 4294959104  ;;  %s1208_s15 = sshll.u32 %s1750_s24, 1  ;;  %s2109_s1 = scalar_lea.vmem [#allocation8], %s1205_s8 }
  0x8e   : > { %p349_p8 = scmp.lt.s32.totalorder %s1208_s15, 3  ;;  %s2111_s9 = scalar_lea.vmem [#allocation9], %s1204_s27 }
  0x8f   : > { %p1209_p10 = scmp.ne.s32.totalorder %s1750_s24, 0 }
  0x90   : > { %s2494_s15 = smov (!%p349_p8, %s1208_s15), 3  ;;  %v1776_v0 = vmov (!%p1209_p10), 0.0  }
  0x91   : > { %s351_s12 = scalar_lea.vmem %s2423_s2, %s2494_s15  ;;  %358 = sbr.rel (%p1209_p10) target bundleno = 153 (0x99), region = 56  ;;  %359 = vst [vmem:[#allocation2] sm:$0xff] (!%p1209_p10), %v1776_v0  ;;  %360 = vst [vmem:[#allocation2 + $0x8] sm:$0xff] (!%p1209_p10), %v1776_v0 }
  0x92   : > { %361 = vst [vmem:[#allocation2 + $0x10] sm:$0xff] (!%p1209_p10), %v1776_v0  ;;  %362 = vst [vmem:[#allocation2 + $0x18] sm:$0xff] (!%p1209_p10), %v1776_v0 }
  0x93   : > { %363 = vst [vmem:[#allocation2 + $0x20] sm:$0xff] (!%p1209_p10), %v1776_v0  ;;  %364 = vst [vmem:[#allocation2 + $0x28] sm:$0xff] (!%p1209_p10), %v1776_v0 }
  0x94   : > { %365 = vst [vmem:[#allocation2 + $0x30] sm:$0xff] (!%p1209_p10), %v1776_v0  ;;  %366 = vst [vmem:[#allocation2 + $0x38] sm:$0xff] (!%p1209_p10), %v1776_v0 }
  0x95   : > { %367 = vst [vmem:[#allocation2 + $0x40] sm:$0xff] (!%p1209_p10), %v1776_v0  ;;  %368 = vst [vmem:[#allocation2 + $0x48] sm:$0xff] (!%p1209_p10), %v1776_v0 }
  0x96   : > { %369 = vst [vmem:[#allocation2 + $0x50] sm:$0xff] (!%p1209_p10), %v1776_v0  ;;  %370 = vst [vmem:[#allocation2 + $0x58] sm:$0xff] (!%p1209_p10), %v1776_v0 }
  0x97   : > { %371 = vst [vmem:[#allocation2 + $0x60] sm:$0xff] (!%p1209_p10), %v1776_v0  ;;  %372 = vst [vmem:[#allocation2 + $0x68] sm:$0xff] (!%p1209_p10), %v1776_v0 }
  0x98   : > { %373 = vst [vmem:[#allocation2 + $0x70] sm:$0xff] %v1776_v0  ;;  %374 = vst [vmem:[#allocation2 + $0x78] sm:$0xff] %v1776_v0 }
  0x99 PF: > { %v392_v1 = vld [vmem:[%s2096_s4 + $0x8] sm:$0xff]  ;;  %v394_v2 = vld [vmem:[%s2096_s4 + $0x18] sm:$0xff]  ;;  %v391_v3 = vld [vmem:[%s2096_s4] sm:$0xff]  ;;  %v1777_v8 = vmov 0.0   ;;  %p1210_p2 = scmp.ne.s32.totalorder %s1750_s24, 1 }
  0x9a   : > { %v1301_v4 = vpack.c.bf16 %v394_v2, %v392_v1  ;;  %v393_v5 = vld [vmem:[%s2096_s4 + $0x10] sm:$0xff]  ;;  %v396_v6 = vld [vmem:[%s2096_s4 + $0x28] sm:$0xff]  ;;  %v398_v7 = vld [vmem:[%s2096_s4 + $0x38] sm:$0xff]  ;;  %499 = vmatprep.mubr.f32.mxu0 %v1777_v8  ;;  %s2469_s18 = sld [smem:[#allocation22_spill]] (!%p1210_p2) }
  0x9b   : > { %v1303_v9 = vpack.c.bf16 %v393_v5, %v391_v3  ;;  %v1305_v10 = vpack.c.bf16 %v398_v7, %v396_v6  ;;  %v395_v11 = vld [vmem:[%s2096_s4 + $0x20] sm:$0xff]  ;;  %v397_v12 = vld [vmem:[%s2096_s4 + $0x30] sm:$0xff]  ;;  %v400_v13 = vld [vmem:[%s2096_s4 + $0x48] sm:$0xff] }
  0x9c   : > { %1302 = vmatprep.subr.bf16.mxu0 %v1301_v4  ;;  %v402_v14 = vld [vmem:[%s2096_s4 + $0x58] sm:$0xff]  ;;  %v1307_v15 = vpack.c.bf16 %v397_v12, %v395_v11  ;;  %v399_v17 = vld [vmem:[%s2096_s4 + $0x40] sm:$0xff]  ;;  %v401_v18 = vld [vmem:[%s2096_s4 + $0x50] sm:$0xff] }
  0x9d   : > { %1304 = vmatpush1.bf16.msra.mxu0 %v1303_v9  ;;  %v1309_v16 = vpack.c.bf16 %v402_v14, %v400_v13  ;;  %v404_v19 = vld [vmem:[%s2096_s4 + $0x68] sm:$0xff]  ;;  %v406_v20 = vld [vmem:[%s2096_s4 + $0x78] sm:$0xff]  ;;  %v1311_v21 = vpack.c.bf16 %v401_v18, %v399_v17  ;;  %v403_v23 = vld [vmem:[%s2096_s4 + $0x60] sm:$0xff] }
  0x9e   : > { %1306 = vmatprep.subr.bf16.mxu0 %v1305_v10  ;;  %v1313_v22 = vpack.c.bf16 %v406_v20, %v404_v19  ;;  %v405_v24 = vld [vmem:[%s2096_s4 + $0x70] sm:$0xff]  ;;  %v408_v25 = vld [vmem:[%s2096_s4 + $0x88] sm:$0xff]  ;;  %v410_v26 = vld [vmem:[%s2096_s4 + $0x98] sm:$0xff] }
  0x9f   : > { %v1315_v27 = vpack.c.bf16 %v405_v24, %v403_v23  ;;  %v1317_v28 = vpack.c.bf16 %v410_v26, %v408_v25  ;;  %v407_v29 = vld [vmem:[%s2096_s4 + $0x80] sm:$0xff]  ;;  %v409_v30 = vld [vmem:[%s2096_s4 + $0x90] sm:$0xff]  ;;  %v412_v31 = vld [vmem:[%s2096_s4 + $0xa8] sm:$0xff] }
  0xa0   : > { %v414_v32 = vld [vmem:[%s2096_s4 + $0xb8] sm:$0xff]  ;;  %v411_v33 = vld [vmem:[%s2096_s4 + $0xa0] sm:$0xff]  ;;  %v413_v34 = vld [vmem:[%s2096_s4 + $0xb0] sm:$0xff]  ;;  %v1319_v35 = vpack.c.bf16 %v409_v30, %v407_v29 }
  0xa1   : > { %1308 = vmatpush1.bf16.msra.mxu0 %v1307_v15  ;;  %v416_v36 = vld [vmem:[%s2096_s4 + $0xc8] sm:$0xff]  ;;  %v418_v37 = vld [vmem:[%s2096_s4 + $0xd8] sm:$0xff]  ;;  %v788_v38 = vld [vmem:[%s2109_s1 + $0x80] sm:$0xff]  ;;  %v1321_v41 = vpack.c.bf16 %v414_v32, %v412_v31  ;;  %v1323_v52 = vpack.c.bf16 %v413_v34, %v411_v33 }
  0xa2   : > { %1310 = vmatprep.subr.bf16.mxu0 %v1309_v16  ;;  %v789_v39 = vld [vmem:[%s2109_s1 + $0x88] sm:$0xff]  ;;  %v772_v40 = vld [vmem:[%s2109_s1] sm:$0xff]  ;;  %v790_v44 = vld [vmem:[%s2109_s1 + $0x90] sm:$0xff]  ;;  %v1325_v55 = vpack.c.bf16 %v418_v37, %v416_v36 }
  0xa3   : > { %v1333_v42 = vpack.c.bf16 %v789_v39, %v788_v38  ;;  %v773_v43 = vld [vmem:[%s2109_s1 + $0x8] sm:$0xff]  ;;  %v791_v45 = vld [vmem:[%s2109_s1 + $0x98] sm:$0xff]  ;;  %v774_v48 = vld [vmem:[%s2109_s1 + $0x10] sm:$0xff] }
  0xa4   : > { %v1335_v46 = vpack.c.bf16 %v773_v43, %v772_v40  ;;  %v1337_v47 = vpack.c.bf16 %v791_v45, %v790_v44  ;;  %v775_v49 = vld [vmem:[%s2109_s1 + $0x18] sm:$0xff]  ;;  %v792_v50 = vld [vmem:[%s2109_s1 + $0xa0] sm:$0xff]  ;;  %v793_v51 = vld [vmem:[%s2109_s1 + $0xa8] sm:$0xff] }
  0xa5   : > { %1312 = vmatpush1.bf16.msra.mxu0 %v1311_v21  ;;  %1334 = vmatprep.subr.bf16.mxu1 %v1333_v42  ;;  %v415_v53 = vld [vmem:[%s2096_s4 + $0xc0] sm:$0xff]  ;;  %v1339_v54 = vpack.c.bf16 %v775_v49, %v774_v48  ;;  %v417_v56 = vld [vmem:[%s2096_s4 + $0xd0] sm:$0xff]  ;;  %v1341_v57 = vpack.c.bf16 %v793_v51, %v792_v50  ;;  %v777_v59 = vld [vmem:[%s2109_s1 + $0x28] sm:$0xff]  ;;  %v425_v50 = vlaneseq }
  0xa6   : > { %1314 = vmatprep.subr.bf16.mxu0 %v1313_v22  ;;  %1336 = vmatpush3.bf16.msra.mxu1 %v1335_v46  ;;  %v776_v58 = vld [vmem:[%s2109_s1 + $0x20] sm:$0xff]  ;;  %v420_v60 = vld [vmem:[%s2096_s4 + $0xe8] sm:$0xff]  ;;  %v422_v61 = vld [vmem:[%s2096_s4 + $0xf8] sm:$0xff]  ;;  %v1327_v62 = vpack.c.bf16 %v417_v56, %v415_v53 }
  0xa7   : > { %1338 = vmatprep.subr.bf16.mxu1 %v1337_v47  ;;  %v1343_v63 = vpack.c.bf16 %v777_v59, %v776_v58  ;;  %v1329_v0 = vpack.c.bf16 %v422_v61, %v420_v60  ;;  %v419_v1 = vld [vmem:[%s2096_s4 + $0xe0] sm:$0xff]  ;;  %v421_v2 = vld [vmem:[%s2096_s4 + $0xf0] sm:$0xff]  ;;  %v376_v5 = vld [vmem:[%s2088_s29 + $0x8] sm:$0xff]  ;;  %v426_v51 = vshrl.u32 %v425_v50, 7 }
  0xa8   : > { %v1331_v3 = vpack.c.bf16 %v421_v2, %v419_v1  ;;  %v375_v4 = vld [vmem:[%s2088_s29] sm:$0xff]  ;;  %v377_v6 = vld [vmem:[%s2088_s29 + $0x10] sm:$0xff]  ;;  %v378_v7 = vld [vmem:[%s2088_s29 + $0x18] sm:$0xff] }
  0xa9   : > { %1316 = vmatpush1.bf16.msra.mxu0 %v1315_v27  ;;  %v379_v9 = vld [vmem:[%s2088_s29 + $0x20] sm:$0xff]  ;;  %v380_v10 = vld [vmem:[%s2088_s29 + $0x28] sm:$0xff]  ;;  %v381_v11 = vld [vmem:[%s2088_s29 + $0x30] sm:$0xff] }
  0xaa   : > { %1318 = vmatprep.subr.bf16.mxu0 %v1317_v28  ;;  %1340 = vmatpush3.bf16.msra.mxu1 %v1339_v54  ;;  %v382_v12 = vld [vmem:[%s2088_s29 + $0x38] sm:$0xff]  ;;  %v383_v13 = vld [vmem:[%s2088_s29 + $0x40] sm:$0xff]  ;;  %v384_v14 = vld [vmem:[%s2088_s29 + $0x48] sm:$0xff]  ;;  %v431_v54 = vsub.s32 1, %v426_v51 }
  0xab   : > { %1342 = vmatprep.subr.bf16.mxu1 %v1341_v57  ;;  %v385_v15 = vld [vmem:[%s2088_s29 + $0x50] sm:$0xff]  ;;  %v386_v16 = vld [vmem:[%s2088_s29 + $0x58] sm:$0xff]  ;;  %v387_v17 = vld [vmem:[%s2088_s29 + $0x60] sm:$0xff] }
  0xac   : > { %v388_v18 = vld [vmem:[%s2088_s29 + $0x68] sm:$0xff]  ;;  %v389_v19 = vld [vmem:[%s2088_s29 + $0x70] sm:$0xff]  ;;  %v390_v20 = vld [vmem:[%s2088_s29 + $0x78] sm:$0xff] }
  0xad   : > { %1320 = vmatpush1.bf16.msra.mxu0 %v1319_v35  ;;  %v794_v21 = vld [vmem:[%s2109_s1 + $0xb0] sm:$0xff]  ;;  %v795_v22 = vld [vmem:[%s2109_s1 + $0xb8] sm:$0xff]  ;;  %v796_v27 = vld [vmem:[%s2109_s1 + $0xc0] sm:$0xff] }
  0xae   : > { %1322 = vmatprep.subr.bf16.mxu0 %v1321_v41  ;;  %1344 = vmatpush3.bf16.msra.mxu1 %v1343_v63  ;;  %v1345_v23 = vpack.c.bf16 %v795_v22, %v794_v21  ;;  %v778_v24 = vld [vmem:[%s2109_s1 + $0x30] sm:$0xff]  ;;  %v779_v25 = vld [vmem:[%s2109_s1 + $0x38] sm:$0xff]  ;;  %v797_v28 = vld [vmem:[%s2109_s1 + $0xc8] sm:$0xff] }
  0xaf   : > { %v1347_v26 = vpack.c.bf16 %v779_v25, %v778_v24  ;;  %v1349_v29 = vpack.c.bf16 %v797_v28, %v796_v27  ;;  %v781_v30 = vld [vmem:[%s2109_s1 + $0x48] sm:$0xff]  ;;  %v798_v32 = vld [vmem:[%s2109_s1 + $0xd0] sm:$0xff]  ;;  %v799_v33 = vld [vmem:[%s2109_s1 + $0xd8] sm:$0xff] }
  0xb0   : > { %1346 = vmatprep.subr.bf16.mxu1 %v1345_v23  ;;  %v1353_v34 = vpack.c.bf16 %v799_v33, %v798_v32  ;;  %v782_v35 = vld [vmem:[%s2109_s1 + $0x50] sm:$0xff]  ;;  %v783_v36 = vld [vmem:[%s2109_s1 + $0x58] sm:$0xff]  ;;  %v800_v38 = vld [vmem:[%s2109_s1 + $0xe0] sm:$0xff] }
  0xb1   : > { %1324 = vmatpush1.bf16.msra.mxu0 %v1323_v52  ;;  %v1355_v37 = vpack.c.bf16 %v783_v36, %v782_v35  ;;  %v801_v39 = vld [vmem:[%s2109_s1 + $0xe8] sm:$0xff]  ;;  %v784_v41 = vld [vmem:[%s2109_s1 + $0x60] sm:$0xff]  ;;  %v802_v44 = vld [vmem:[%s2109_s1 + $0xf0] sm:$0xff]  ;;  %v427_v52 = vsub.s32 0, %v426_v51 }
  0xb2   : > { %1326 = vmatprep.subr.bf16.mxu0 %v1325_v55  ;;  %1348 = vmatpush3.bf16.msra.mxu1 %v1347_v26  ;;  %v1357_v40 = vpack.c.bf16 %v801_v39, %v800_v38  ;;  %v785_v42 = vld [vmem:[%s2109_s1 + $0x68] sm:$0xff]  ;;  %v803_v45 = vld [vmem:[%s2109_s1 + $0xf8] sm:$0xff]  ;;  %v786_v47 = vld [vmem:[%s2109_s1 + $0x70] sm:$0xff] }
  0xb3   : > { %1350 = vmatprep.subr.bf16.mxu1 %v1349_v29  ;;  %v1359_v43 = vpack.c.bf16 %v785_v42, %v784_v41  ;;  %v1361_v46 = vpack.c.bf16 %v803_v45, %v802_v44  ;;  %v787_v48 = vld [vmem:[%s2109_s1 + $0x78] sm:$0xff]  ;;  %v423_v53 = vld [vmem:[%s351_s12] sm:$0x3] }
  0xb4   : > { %v1363_v49 = vpack.c.bf16 %v787_v48, %v786_v47  ;;  %v2215_v55 = vrot.slane %v423_v53, %v427_v52  ;;  %v2217_v56 = vrot.slane %v423_v53, %v431_v54 }
  0xb5   : > { %1328 = vmatpush1.bf16.msra.mxu0 %v1327_v62 }
  0xb6   : > { %1330 = vmatprep.subr.bf16.mxu0 %v1329_v0 }
  0xb9   : > { %1332 = vmatpush1.bf16.msra.mxu0 %v1331_v3 }
  0xbc   : > { %500 = vmatmul.mubr.f32.vlgmr.msra.gmra.mrb[0].mxu0 %v375_v4 }
  0xbd   : > { %505 = vmatprep.mubr.f32.mxu0 %v1777_v8 }
  0xc0   : > { %506 = vmatmul.mubr.f32.gmra.mrb[2].mxu0 %v376_v5 }
  0xc1   : > { %511 = vmatprep.mubr.f32.mxu0 %v1777_v8 }
  0xc4   : > { %512 = vmatmul.mubr.f32.gmra.mrb[4].mxu0 %v377_v6 }
  0xc5   : > { %517 = vmatprep.mubr.f32.mxu0 %v1777_v8 }
  0xc8   : > { %518 = vmatmul.mubr.f32.gmra.mrb[6].mxu0 %v378_v7 }
  0xc9   : > { %523 = vmatprep.mubr.f32.mxu0 %v1777_v8 }
  0xcc   : > { %524 = vmatmul.mubr.f32.gmra.mrb[8].mxu0 %v379_v9 }
  0xcd   : > { %529 = vmatprep.mubr.f32.mxu0 %v1777_v8 }
  0xd0   : > { %530 = vmatmul.mubr.f32.gmra.mrb[10].mxu0 %v380_v10 }
  0xd1   : > { %535 = vmatprep.mubr.f32.mxu0 %v1777_v8 }
  0xd4   : > { %536 = vmatmul.mubr.f32.gmra.mrb[12].mxu0 %v381_v11 }
  0xd5   : > { %541 = vmatprep.mubr.f32.mxu0 %v1777_v8 }
  0xd8   : > { %542 = vmatmul.mubr.f32.gmra.mrb[14].mxu0 %v382_v12 }
  0xd9   : > { %547 = vmatprep.mubr.f32.mxu0 %v1777_v8 }
  0xdc   : > { %548 = vmatmul.mubr.f32.gmra.mrb[16].mxu0 %v383_v13 }
  0xdd   : > { %553 = vmatprep.mubr.f32.mxu0 %v1777_v8 }
  0xe0   : > { %554 = vmatmul.mubr.f32.gmra.mrb[18].mxu0 %v384_v14 }
  0xe1   : > { %559 = vmatprep.mubr.f32.mxu0 %v1777_v8 }
  0xe4   : > { %560 = vmatmul.mubr.f32.gmra.mrb[20].mxu0 %v385_v15 }
  0xe5   : > { %565 = vmatprep.mubr.f32.mxu0 %v1777_v8 }
  0xe8   : > { %566 = vmatmul.mubr.f32.gmra.mrb[22].mxu0 %v386_v16 }
  0xe9   : > { %571 = vmatprep.mubr.f32.mxu0 %v1777_v8 }
  0xec   : > { %572 = vmatmul.mubr.f32.gmra.mrb[24].mxu0 %v387_v17 }
  0xed   : > { %577 = vmatprep.mubr.f32.mxu0 %v1777_v8 }
  0xf0   : > { %578 = vmatmul.mubr.f32.gmra.mrb[26].mxu0 %v388_v18 }
  0xf1   : > { %583 = vmatprep.mubr.f32.mxu0 %v1777_v8 }
  0xf4   : > { %584 = vmatmul.mubr.f32.gmra.mrb[28].mxu0 %v389_v19 }
  0xf5   : > { %589 = vmatprep.mubr.f32.mxu0 %v1777_v8  ;;  %v780_v8 = vld [vmem:[%s2109_s1 + $0x40] sm:$0xff] }
  0xf6   : > { %v1351_v31 = vpack.c.bf16 %v781_v30, %v780_v8 }
  0xf8   : > { %590 = vmatmul.mubr.f32.gmra.mrb[30].mxu0 %v390_v20  ;;  %1352 = vmatpush3.bf16.msra.mxu1 %v1351_v31 }
  0xf9   : > { %1354 = vmatprep.subr.bf16.mxu1 %v1353_v34 }
  0xfc   : > { %1356 = vmatpush3.bf16.msra.mxu1 %v1355_v37 }
  0xfd   : > { %1358 = vmatprep.subr.bf16.mxu1 %v1357_v40 }
 0x100   : > { %1360 = vmatpush3.bf16.msra.mxu1 %v1359_v43 }
 0x101   : > { %1362 = vmatprep.subr.bf16.mxu1 %v1361_v46 }
 0x104   : > { %1364 = vmatpush3.bf16.msra.mxu1 %v1363_v49 }
 0x18f   : > { %v501_v57 = vpop.f32.mrb[0].mxu0 }
 0x190   : > { %v502_v58 = vadd.f32 %v501_v57, %v2215_v55  ;;  %v503_v59 = vpop.f32.mrb[1].mxu0 }
 0x191   : > { %v504_v60 = vadd.f32 %v503_v59, %v2217_v56 }
 0x192   : > { %v628_v61 = vmul.f32 0.70710677, %v502_v58  ;;  %v596_v26 = vmul.f32 0.5, %v502_v58 }
 0x193   : > { %v629_v62 = vmul.f32 0.70710677, %v504_v60  ;;  %v507_v63 = vpop.f32.mrb[2].mxu0  ;;  %v597_v24 = vmul.f32 0.5, %v504_v60 }
 0x194   : > { %1486 = verf.f32 %v628_v61  ;;  %v508_v0 = vadd.f32 %v507_v63, %v2215_v55  ;;  %v509_v1 = vpop.f32.mrb[3].mxu0 }
 0x195   : > { %1488 = verf.f32 %v629_v62  ;;  %v510_v2 = vadd.f32 %v509_v1, %v2217_v56 }
 0x196   : > { %v630_v3 = vmul.f32 0.70710677, %v508_v0  ;;  %v598_v39 = vmul.f32 0.5, %v508_v0 }
 0x197   : > { %v631_v4 = vmul.f32 0.70710677, %v510_v2  ;;  %v513_v5 = vpop.f32.mrb[4].mxu0  ;;  %v599_v35 = vmul.f32 0.5, %v510_v2 }
 0x198   : > { %1490 = verf.f32 %v630_v3  ;;  %v514_v6 = vadd.f32 %v513_v5, %v2215_v55  ;;  %v515_v7 = vpop.f32.mrb[5].mxu0 }
 0x199   : > { %1492 = verf.f32 %v631_v4  ;;  %v516_v9 = vadd.f32 %v515_v7, %v2217_v56 }
 0x19a   : > { %v632_v10 = vmul.f32 0.70710677, %v514_v6  ;;  %v600_v53 = vmul.f32 0.5, %v514_v6 }
 0x19b   : > { %v633_v11 = vmul.f32 0.70710677, %v516_v9  ;;  %v519_v12 = vpop.f32.mrb[6].mxu0  ;;  %v601_v49 = vmul.f32 0.5, %v516_v9 }
 0x19c   : > { %1494 = verf.f32 %v632_v10  ;;  %v2226_v13 = vadd.f32 %v519_v12, %v2215_v55  ;;  %v521_v14 = vpop.f32.mrb[7].mxu0 }
 0x19d   : > { %1496 = verf.f32 %v633_v11  ;;  %v522_v15 = vadd.f32 %v521_v14, %v2217_v56 }
 0x19e   : > { %v1487_v16 = vpop.eup %1486  ;;  %v634_v17 = vmul.f32 0.70710677, %v2226_v13  ;;  %v602_v5 = vmul.f32 0.5, %v2226_v13 }
 0x19f   : > { %v1489_v18 = vpop.eup %1488  ;;  %v692_v19 = vadd.f32 1.0, %v1487_v16  ;;  %v635_v20 = vmul.f32 0.70710677, %v522_v15  ;;  %v525_v21 = vpop.f32.mrb[8].mxu0  ;;  %v603_v1 = vmul.f32 0.5, %v522_v15 }
 0x1a0   : > { %1498 = verf.f32 %v634_v17  ;;  %v2231_v22 = vadd.f32 %v525_v21, %v2215_v55  ;;  %v527_v23 = vpop.f32.mrb[9].mxu0  ;;  %v693_v25 = vadd.f32 1.0, %v1489_v18 }
 0x1a1   : > { %1500 = verf.f32 %v635_v20  ;;  %v2234_v27 = vadd.f32 %v527_v23, %v2217_v56  ;;  %v724_v34 = vmul.f32 %v692_v19, %v596_v26 }
 0x1a2   : > { %v1491_v28 = vpop.eup %1490  ;;  %v636_v29 = vmul.f32 0.70710677, %v2231_v22  ;;  %v725_v8 = vmul.f32 %v693_v25, %v597_v24  ;;  %v604_v20 = vmul.f32 0.5, %v2231_v22 }
 0x1a3   : > { %v1493_v30 = vpop.eup %1492  ;;  %v694_v31 = vadd.f32 1.0, %v1491_v28  ;;  %v637_v32 = vmul.f32 0.70710677, %v2234_v27  ;;  %v531_v33 = vpop.f32.mrb[10].mxu0  ;;  %v605_v17 = vmul.f32 0.5, %v2234_v27 }
 0x1a4   : > { %v695_v36 = vadd.f32 1.0, %v1493_v30  ;;  %1502 = verf.f32 %v636_v29  ;;  %v2239_v37 = vadd.f32 %v531_v33, %v2215_v55  ;;  %v533_v38 = vpop.f32.mrb[11].mxu0  ;;  %868 = vmatprep.mubr.f32.mxu1 %v725_v8 }
 0x1a5   : > { %1504 = verf.f32 %v637_v32  ;;  %v2242_v40 = vadd.f32 %v533_v38, %v2217_v56  ;;  %869 = vmatmul.mubr.f32.vlgmr.msra.gmra.mrb[0].mxu1 %v724_v34  ;;  %v726_v48 = vmul.f32 %v694_v31, %v598_v39 }
 0x1a6   : > { %v1495_v41 = vpop.eup %1494  ;;  %v638_v42 = vmul.f32 0.70710677, %v2239_v37  ;;  %v727_v43 = vmul.f32 %v695_v36, %v599_v35  ;;  %v606_v33 = vmul.f32 0.5, %v2239_v37 }
 0x1a7   : > { %v1497_v44 = vpop.eup %1496  ;;  %v696_v45 = vadd.f32 1.0, %v1495_v41  ;;  %v639_v46 = vmul.f32 0.70710677, %v2242_v40  ;;  %v537_v47 = vpop.f32.mrb[12].mxu0  ;;  %v607_v30 = vmul.f32 0.5, %v2242_v40 }
 0x1a8   : > { %v697_v50 = vadd.f32 1.0, %v1497_v44  ;;  %1506 = verf.f32 %v638_v42  ;;  %v2247_v51 = vadd.f32 %v537_v47, %v2215_v55  ;;  %v539_v52 = vpop.f32.mrb[13].mxu0  ;;  %873 = vmatprep.mubr.f32.mxu1 %v727_v43 }
 0x1a9   : > { %1508 = verf.f32 %v639_v46  ;;  %v2250_v54 = vadd.f32 %v539_v52, %v2217_v56  ;;  %874 = vmatmul.mubr.f32.gmra.mrb[2].mxu1 %v726_v48  ;;  %v728_v0 = vmul.f32 %v696_v45, %v600_v53 }
 0x1aa   : > { %v1499_v57 = vpop.eup %1498  ;;  %v640_v58 = vmul.f32 0.70710677, %v2247_v51  ;;  %v729_v59 = vmul.f32 %v697_v50, %v601_v49  ;;  %v608_v47 = vmul.f32 0.5, %v2247_v51 }
 0x1ab   : > { %v1501_v60 = vpop.eup %1500  ;;  %v698_v61 = vadd.f32 1.0, %v1499_v57  ;;  %v641_v62 = vmul.f32 0.70710677, %v2250_v54  ;;  %v543_v63 = vpop.f32.mrb[14].mxu0  ;;  %v609_v44 = vmul.f32 0.5, %v2250_v54 }
 0x1ac   : > { %v699_v2 = vadd.f32 1.0, %v1501_v60  ;;  %1510 = verf.f32 %v640_v58  ;;  %v2255_v3 = vadd.f32 %v543_v63, %v2215_v55  ;;  %v545_v4 = vpop.f32.mrb[15].mxu0  ;;  %878 = vmatprep.mubr.f32.mxu1 %v729_v59 }
 0x1ad   : > { %1512 = verf.f32 %v641_v62  ;;  %v2259_v6 = vadd.f32 %v545_v4, %v2217_v56  ;;  %879 = vmatmul.mubr.f32.gmra.mrb[4].mxu1 %v728_v0  ;;  %v730_v16 = vmul.f32 %v698_v61, %v602_v5 }
 0x1ae   : > { %v1503_v7 = vpop.eup %1502  ;;  %v642_v9 = vmul.f32 0.70710677, %v2255_v3  ;;  %v731_v10 = vmul.f32 %v699_v2, %v603_v1  ;;  %v610_v63 = vmul.f32 0.5, %v2255_v3 }
 0x1af   : > { %v1505_v11 = vpop.eup %1504  ;;  %v700_v12 = vadd.f32 1.0, %v1503_v7  ;;  %v643_v14 = vmul.f32 0.70710677, %v2259_v6  ;;  %v549_v15 = vpop.f32.mrb[16].mxu0  ;;  %v611_v60 = vmul.f32 0.5, %v2259_v6 }
 0x1b0   : > { %v701_v18 = vadd.f32 1.0, %v1505_v11  ;;  %1514 = verf.f32 %v642_v9  ;;  %v2265_v13 = vadd.f32 %v549_v15, %v2215_v55  ;;  %v551_v19 = vpop.f32.mrb[17].mxu0  ;;  %883 = vmatprep.mubr.f32.mxu1 %v731_v10 }
 0x1b1   : > { %1516 = verf.f32 %v643_v14  ;;  %v2269_v21 = vadd.f32 %v551_v19, %v2217_v56  ;;  %884 = vmatmul.mubr.f32.gmra.mrb[6].mxu1 %v730_v16  ;;  %v732_v8 = vmul.f32 %v700_v12, %v604_v20 }
 0x1b2   : > { %v1507_v23 = vpop.eup %1506  ;;  %v644_v24 = vmul.f32 0.70710677, %v2265_v13  ;;  %v733_v25 = vmul.f32 %v701_v18, %v605_v17  ;;  %v612_v15 = vmul.f32 0.5, %v2265_v13 }
 0x1b3   : > { %v1509_v26 = vpop.eup %1508  ;;  %v702_v27 = vadd.f32 1.0, %v1507_v23  ;;  %v645_v28 = vmul.f32 0.70710677, %v2269_v21  ;;  %v555_v29 = vpop.f32.mrb[18].mxu0  ;;  %v613_v11 = vmul.f32 0.5, %v2269_v21 }
 0x1b4   : > { %v703_v31 = vadd.f32 1.0, %v1509_v26  ;;  %1518 = verf.f32 %v644_v24  ;;  %v2275_v22 = vadd.f32 %v555_v29, %v2215_v55  ;;  %v557_v32 = vpop.f32.mrb[19].mxu0  ;;  %888 = vmatprep.mubr.f32.mxu1 %v733_v25 }
 0x1b5   : > { %1520 = verf.f32 %v645_v28  ;;  %v2279_v34 = vadd.f32 %v557_v32, %v2217_v56  ;;  %889 = vmatmul.mubr.f32.gmra.mrb[8].mxu1 %v732_v8  ;;  %v734_v43 = vmul.f32 %v702_v27, %v606_v33 }
 0x1b6   : > { %v1511_v35 = vpop.eup %1510  ;;  %v646_v36 = vmul.f32 0.70710677, %v2275_v22  ;;  %v735_v38 = vmul.f32 %v703_v31, %v607_v30  ;;  %v614_v29 = vmul.f32 0.5, %v2275_v22 }
 0x1b7   : > { %v1513_v39 = vpop.eup %1512  ;;  %v704_v40 = vadd.f32 1.0, %v1511_v35  ;;  %v647_v41 = vmul.f32 0.70710677, %v2279_v34  ;;  %v561_v42 = vpop.f32.mrb[20].mxu0  ;;  %v615_v26 = vmul.f32 0.5, %v2279_v34 }
 0x1b8   : > { %v705_v45 = vadd.f32 1.0, %v1513_v39  ;;  %1522 = verf.f32 %v646_v36  ;;  %v2285_v37 = vadd.f32 %v561_v42, %v2215_v55  ;;  %v563_v46 = vpop.f32.mrb[21].mxu0  ;;  %893 = vmatprep.mubr.f32.mxu1 %v735_v38 }
 0x1b9   : > { %1524 = verf.f32 %v647_v41  ;;  %v2289_v48 = vadd.f32 %v563_v46, %v2217_v56  ;;  %894 = vmatmul.mubr.f32.gmra.mrb[10].mxu1 %v734_v43  ;;  %v736_v59 = vmul.f32 %v704_v40, %v608_v47 }
 0x1ba   : > { %v1515_v49 = vpop.eup %1514  ;;  %v648_v50 = vmul.f32 0.70710677, %v2285_v37  ;;  %v737_v52 = vmul.f32 %v705_v45, %v609_v44  ;;  %v616_v42 = vmul.f32 0.5, %v2285_v37 }
 0x1bb   : > { %v1517_v53 = vpop.eup %1516  ;;  %v706_v54 = vadd.f32 1.0, %v1515_v49  ;;  %v649_v57 = vmul.f32 0.70710677, %v2289_v48  ;;  %v567_v58 = vpop.f32.mrb[22].mxu0  ;;  %v617_v39 = vmul.f32 0.5, %v2289_v48 }
 0x1bc   : > { %v707_v61 = vadd.f32 1.0, %v1517_v53  ;;  %1526 = verf.f32 %v648_v50  ;;  %v2295_v51 = vadd.f32 %v567_v58, %v2215_v55  ;;  %v569_v62 = vpop.f32.mrb[23].mxu0  ;;  %898 = vmatprep.mubr.f32.mxu1 %v737_v52 }
 0x1bd   : > { %1528 = verf.f32 %v649_v57  ;;  %v2299_v0 = vadd.f32 %v569_v62, %v2217_v56  ;;  %899 = vmatmul.mubr.f32.gmra.mrb[12].mxu1 %v736_v59  ;;  %v738_v10 = vmul.f32 %v706_v54, %v610_v63 }
 0x1be   : > { %v1519_v1 = vpop.eup %1518  ;;  %v650_v2 = vmul.f32 0.70710677, %v2295_v51  ;;  %v739_v4 = vmul.f32 %v707_v61, %v611_v60  ;;  %v618_v37 = vmul.f32 0.5, %v2295_v51 }
 0x1bf   : > { %v1521_v5 = vpop.eup %1520  ;;  %v708_v6 = vadd.f32 1.0, %v1519_v1  ;;  %v651_v7 = vmul.f32 0.70710677, %v2299_v0  ;;  %v573_v9 = vpop.f32.mrb[24].mxu0  ;;  %v619_v53 = vmul.f32 0.5, %v2299_v0 }
 0x1c0   : > { %v709_v12 = vadd.f32 1.0, %v1521_v5  ;;  %1530 = verf.f32 %v650_v2  ;;  %v2305_v3 = vadd.f32 %v573_v9, %v2215_v55  ;;  %v575_v14 = vpop.f32.mrb[25].mxu0  ;;  %903 = vmatprep.mubr.f32.mxu1 %v739_v4 }
 0x1c1   : > { %1532 = verf.f32 %v651_v7  ;;  %v2309_v16 = vadd.f32 %v575_v14, %v2217_v56  ;;  %904 = vmatmul.mubr.f32.gmra.mrb[14].mxu1 %v738_v10  ;;  %v740_v25 = vmul.f32 %v708_v6, %v612_v15 }
 0x1c2   : > { %v1523_v17 = vpop.eup %1522  ;;  %v652_v18 = vmul.f32 0.70710677, %v2305_v3  ;;  %v741_v19 = vmul.f32 %v709_v12, %v613_v11 }
 0x1c3   : > { %v1525_v20 = vpop.eup %1524  ;;  %v710_v21 = vadd.f32 1.0, %v1523_v17  ;;  %v653_v23 = vmul.f32 0.70710677, %v2309_v16  ;;  %v579_v24 = vpop.f32.mrb[26].mxu0  ;;  %v621_v0 = vmul.f32 0.5, %v2309_v16 }
 0x1c4   : > { %v711_v27 = vadd.f32 1.0, %v1525_v20  ;;  %1534 = verf.f32 %v652_v18  ;;  %v2315_v13 = vadd.f32 %v579_v24, %v2215_v55  ;;  %v581_v28 = vpop.f32.mrb[27].mxu0  ;;  %908 = vmatprep.mubr.f32.mxu1 %v741_v19 }
 0x1c5   : > { %1536 = verf.f32 %v653_v23  ;;  %v582_v8 = vadd.f32 %v581_v28, %v2217_v56  ;;  %909 = vmatmul.mubr.f32.gmra.mrb[16].mxu1 %v740_v25  ;;  %v742_v38 = vmul.f32 %v710_v21, %v614_v29 }
 0x1c6   : > { %v1527_v30 = vpop.eup %1526  ;;  %v654_v31 = vmul.f32 0.70710677, %v2315_v13  ;;  %v743_v32 = vmul.f32 %v711_v27, %v615_v26  ;;  %v622_v12 = vmul.f32 0.5, %v2315_v13 }
 0x1c7   : > { %v1529_v33 = vpop.eup %1528  ;;  %v712_v35 = vadd.f32 1.0, %v1527_v30  ;;  %v655_v34 = vmul.f32 0.70710677, %v582_v8  ;;  %v585_v36 = vpop.f32.mrb[28].mxu0  ;;  %v623_v10 = vmul.f32 0.5, %v582_v8 }
 0x1c8   : > { %v713_v40 = vadd.f32 1.0, %v1529_v33  ;;  %1538 = verf.f32 %v654_v31  ;;  %v586_v41 = vadd.f32 %v585_v36, %v2215_v55  ;;  %v587_v22 = vpop.f32.mrb[29].mxu0  ;;  %913 = vmatprep.mubr.f32.mxu1 %v743_v32  ;;  %v756_v31 = vld [vmem:[#allocation2] sm:$0xff]  ;;  %v757_v36 = vld [vmem:[#allocation2 + $0x8] sm:$0xff] }
 0x1c9   : > { %1540 = verf.f32 %v655_v34  ;;  %v588_v43 = vadd.f32 %v587_v22, %v2217_v56  ;;  %914 = vmatmul.mubr.f32.gmra.mrb[18].mxu1 %v742_v38  ;;  %v744_v48 = vmul.f32 %v712_v35, %v616_v42  ;;  %v758_v22 = vld [vmem:[#allocation2 + $0x10] sm:$0xff] }
 0x1ca   : > { %v1531_v44 = vpop.eup %1530  ;;  %v656_v45 = vmul.f32 0.70710677, %v586_v41  ;;  %v745_v46 = vmul.f32 %v713_v40, %v617_v39  ;;  %v624_v20 = vmul.f32 0.5, %v586_v41 }
 0x1cb   : > { %v1533_v47 = vpop.eup %1532  ;;  %v714_v49 = vadd.f32 1.0, %v1531_v44  ;;  %v657_v50 = vmul.f32 0.70710677, %v588_v43  ;;  %v591_v52 = vpop.f32.mrb[30].mxu0  ;;  %v625_v19 = vmul.f32 0.5, %v588_v43 }
 0x1cc   : > { %v715_v54 = vadd.f32 1.0, %v1533_v47  ;;  %1542 = verf.f32 %v656_v45  ;;  %v592_v57 = vadd.f32 %v591_v52, %v2215_v55  ;;  %v593_v58 = vpop.f32.mrb[31].mxu0  ;;  %918 = vmatprep.mubr.f32.mxu1 %v745_v46  ;;  %v620_v55 = vmul.f32 0.5, %v2305_v3  ;;  %v759_v46 = vld [vmem:[#allocation2 + $0x18] sm:$0xff] }
 0x1cd   : > { %1544 = verf.f32 %v657_v50  ;;  %v594_v59 = vadd.f32 %v593_v58, %v2217_v56  ;;  %919 = vmatmul.mubr.f32.gmra.mrb[20].mxu1 %v744_v48  ;;  %v746_v4 = vmul.f32 %v714_v49, %v618_v37  ;;  %v760_v48 = vld [vmem:[#allocation2 + $0x20] sm:$0xff]  ;;  %v761_v37 = vld [vmem:[#allocation2 + $0x28] sm:$0xff] }
 0x1ce   : > { %v1535_v60 = vpop.eup %1534  ;;  %v658_v61 = vmul.f32 0.70710677, %v592_v57  ;;  %v747_v62 = vmul.f32 %v715_v54, %v619_v53  ;;  %v626_v13 = vmul.f32 0.5, %v592_v57 }
 0x1cf   : > { %v1537_v63 = vpop.eup %1536  ;;  %v716_v1 = vadd.f32 1.0, %v1535_v60  ;;  %v659_v2 = vmul.f32 0.70710677, %v594_v59  ;;  %v627_v27 = vmul.f32 0.5, %v594_v59 }
 0x1d0   : > { %v717_v5 = vadd.f32 1.0, %v1537_v63  ;;  %1546 = verf.f32 %v658_v61  ;;  %923 = vmatprep.mubr.f32.mxu1 %v747_v62  ;;  %v762_v63 = vld [vmem:[#allocation2 + $0x30] sm:$0xff] }
 0x1d1   : > { %1548 = verf.f32 %v659_v2  ;;  %924 = vmatmul.mubr.f32.gmra.mrb[22].mxu1 %v746_v4  ;;  %v748_v9 = vmul.f32 %v716_v1, %v620_v55 }
 0x1d2   : > { %v1539_v51 = vpop.eup %1538  ;;  %v749_v6 = vmul.f32 %v717_v5, %v621_v0  ;;  %v763_v5 = vld [vmem:[#allocation2 + $0x38] sm:$0xff] }
 0x1d3   : > { %v1541_v56 = vpop.eup %1540  ;;  %v718_v7 = vadd.f32 1.0, %v1539_v51 }
 0x1d4   : > { %v719_v11 = vadd.f32 1.0, %v1541_v56  ;;  %928 = vmatprep.mubr.f32.mxu1 %v749_v6 }
 0x1d5   : > { %929 = vmatmul.mubr.f32.gmra.mrb[24].mxu1 %v748_v9  ;;  %v750_v18 = vmul.f32 %v718_v7, %v622_v12  ;;  %v764_v7 = vld [vmem:[#allocation2 + $0x40] sm:$0xff] }
 0x1d6   : > { %v1543_v14 = vpop.eup %1542  ;;  %v751_v15 = vmul.f32 %v719_v11, %v623_v10 }
 0x1d7   : > { %v1545_v16 = vpop.eup %1544  ;;  %v720_v17 = vadd.f32 1.0, %v1543_v14  ;;  %v765_v14 = vld [vmem:[#allocation2 + $0x48] sm:$0xff] }
 0x1d8   : > { %v721_v3 = vadd.f32 1.0, %v1545_v16  ;;  %933 = vmatprep.mubr.f32.mxu1 %v751_v15 }
 0x1d9   : > { %934 = vmatmul.mubr.f32.gmra.mrb[26].mxu1 %v750_v18  ;;  %v752_v26 = vmul.f32 %v720_v17, %v624_v20 }
 0x1da   : > { %v1547_v21 = vpop.eup %1546  ;;  %v753_v23 = vmul.f32 %v721_v3, %v625_v19  ;;  %v766_v19 = vld [vmem:[#allocation2 + $0x50] sm:$0xff] }
 0x1db   : > { %v1549_v24 = vpop.eup %1548  ;;  %v722_v25 = vadd.f32 1.0, %v1547_v21 }
 0x1dc   : > { %v723_v28 = vadd.f32 1.0, %v1549_v24  ;;  %938 = vmatprep.mubr.f32.mxu1 %v753_v23  ;;  %v767_v24 = vld [vmem:[#allocation2 + $0x58] sm:$0xff] }
 0x1dd   : > { %939 = vmatmul.mubr.f32.gmra.mrb[28].mxu1 %v752_v26  ;;  %v754_v8 = vmul.f32 %v722_v25, %v626_v13  ;;  %v768_v13 = vld [vmem:[#allocation2 + $0x60] sm:$0xff] }
 0x1de   : > { %v755_v29 = vmul.f32 %v723_v28, %v627_v27 }
 0x1e0   : > { %943 = vmatprep.mubr.f32.mxu1 %v755_v29 }
 0x1e1   : > { %944 = vmatmul.mubr.f32.gmra.mrb[30].mxu1 %v754_v8 }
 0x278   : > { %v1253_v30 = vpop.f32.mrb[0].mxu1 }
 0x279   : > { %v1254_v32 = vpop.f32.mrb[1].mxu1 }
 0x27a   : > { %v1255_v33 = vadd.f32 %v1254_v32, %v1253_v30  ;;  %v769_v32 = vld [vmem:[#allocation2 + $0x68] sm:$0xff] }
 0x27c   : > { %v949_v35 = vadd.f32 %v1255_v33, %v756_v31  ;;  %v1256_v34 = vpop.f32.mrb[2].mxu1 }
 0x27d   : > { %v1257_v38 = vpop.f32.mrb[3].mxu1 }
 0x27e   : > { %965 = vst [vmem:[#allocation2] sm:$0xff] %v949_v35  ;;  %v1258_v39 = vadd.f32 %v1257_v38, %v1256_v34  ;;  %v770_v38 = vld [vmem:[#allocation2 + $0x70] sm:$0xff] }
 0x280   : > { %v950_v40 = vadd.f32 %v1258_v39, %v757_v36  ;;  %v1259_v41 = vpop.f32.mrb[4].mxu1 }
 0x281   : > { %v1260_v42 = vpop.f32.mrb[5].mxu1 }
 0x282   : > { %966 = vst [vmem:[#allocation2 + $0x8] sm:$0xff] %v950_v40  ;;  %v1261_v43 = vadd.f32 %v1260_v42, %v1259_v41  ;;  %v771_v42 = vld [vmem:[#allocation2 + $0x78] sm:$0xff] }
 0x284   : > { %v951_v44 = vadd.f32 %v1261_v43, %v758_v22  ;;  %v1262_v45 = vpop.f32.mrb[6].mxu1 }
 0x285   : > { %v1263_v47 = vpop.f32.mrb[7].mxu1 }
 0x286   : > { %967 = vst [vmem:[#allocation2 + $0x10] sm:$0xff] %v951_v44  ;;  %v1264_v49 = vadd.f32 %v1263_v47, %v1262_v45  ;;  %v1211_v47 = vld [vmem:[%s2469_s18] ss:$0 sm:$0xff] (!%p1210_p2) }
 0x288   : > { %v952_v50 = vadd.f32 %v1264_v49, %v759_v46  ;;  %v1265_v52 = vpop.f32.mrb[8].mxu1  ;;  %v985_v46 = vld [vmem:[#allocation2] sm:$0xff] (!%p1210_p2) }
 0x289   : > { %v1266_v53 = vpop.f32.mrb[9].mxu1  ;;  %v986_v49 = vld [vmem:[#allocation2 + $0x8] sm:$0xff] (!%p1210_p2) }
 0x28a   : > { %968 = vst [vmem:[#allocation2 + $0x18] sm:$0xff] %v952_v50  ;;  %v1267_v54 = vadd.f32 %v1266_v53, %v1265_v52  ;;  %v1008_v50 = vadd.f32 (!%p1210_p2), %v1211_v47, %v985_v46  ;;  %v1009_v52 = vadd.f32 (!%p1210_p2), %v1211_v47, %v986_v49 }
 0x28c   : > { %v953_v57 = vadd.f32 %v1267_v54, %v760_v48  ;;  %v1268_v58 = vpop.f32.mrb[10].mxu1  ;;  %1024 = vst [vmem:[%s2111_s9] sm:$0xff] (!%p1210_p2), %v1008_v50  ;;  %1025 = vst [vmem:[%s2111_s9 + $0x8] sm:$0xff] (!%p1210_p2), %v1009_v52 }
 0x28d   : > { %v1269_v59 = vpop.f32.mrb[11].mxu1  ;;  %v987_v48 = vld [vmem:[#allocation2 + $0x10] sm:$0xff] (!%p1210_p2) }
 0x28e   : > { %969 = vst [vmem:[#allocation2 + $0x20] sm:$0xff] %v953_v57  ;;  %v1270_v60 = vadd.f32 %v1269_v59, %v1268_v58  ;;  %v1010_v57 = vadd.f32 (!%p1210_p2), %v1211_v47, %v987_v48 }
 0x290   : > { %v954_v61 = vadd.f32 %v1270_v60, %v761_v37  ;;  %v1271_v62 = vpop.f32.mrb[12].mxu1  ;;  %1026 = vst [vmem:[%s2111_s9 + $0x10] sm:$0xff] (!%p1210_p2), %v1010_v57 }
 0x291   : > { %v1272_v1 = vpop.f32.mrb[13].mxu1  ;;  %v988_v53 = vld [vmem:[#allocation2 + $0x18] sm:$0xff] (!%p1210_p2) }
 0x292   : > { %970 = vst [vmem:[#allocation2 + $0x28] sm:$0xff] %v954_v61  ;;  %v1273_v2 = vadd.f32 %v1272_v1, %v1271_v62  ;;  %v1011_v58 = vadd.f32 (!%p1210_p2), %v1211_v47, %v988_v53 }
 0x294   : > { %v955_v4 = vadd.f32 %v1273_v2, %v762_v63  ;;  %v1274_v0 = vpop.f32.mrb[14].mxu1  ;;  %1027 = vst [vmem:[%s2111_s9 + $0x18] sm:$0xff] (!%p1210_p2), %v1011_v58 }
 0x295   : > { %v1275_v55 = vpop.f32.mrb[15].mxu1  ;;  %v989_v54 = vld [vmem:[#allocation2 + $0x20] sm:$0xff] (!%p1210_p2) }
 0x296   : > { %971 = vst [vmem:[#allocation2 + $0x30] sm:$0xff] %v955_v4  ;;  %v1276_v51 = vadd.f32 %v1275_v55, %v1274_v0  ;;  %v1012_v37 = vadd.f32 (!%p1210_p2), %v1211_v47, %v989_v54 }
 0x298   : > { %v956_v6 = vadd.f32 %v1276_v51, %v763_v5  ;;  %v1277_v56 = vpop.f32.mrb[16].mxu1  ;;  %1028 = vst [vmem:[%s2111_s9 + $0x20] sm:$0xff] (!%p1210_p2), %v1012_v37 }
 0x299   : > { %v1278_v9 = vpop.f32.mrb[17].mxu1  ;;  %v990_v59 = vld [vmem:[#allocation2 + $0x28] sm:$0xff] (!%p1210_p2) }
 0x29a   : > { %972 = vst [vmem:[#allocation2 + $0x38] sm:$0xff] %v956_v6  ;;  %v1279_v10 = vadd.f32 %v1278_v9, %v1277_v56  ;;  %v1013_v62 = vadd.f32 (!%p1210_p2), %v1211_v47, %v990_v59 }
 0x29c   : > { %v957_v11 = vadd.f32 %v1279_v10, %v764_v7  ;;  %v1280_v12 = vpop.f32.mrb[18].mxu1  ;;  %1029 = vst [vmem:[%s2111_s9 + $0x28] sm:$0xff] (!%p1210_p2), %v1013_v62 }
 0x29d   : > { %v1281_v15 = vpop.f32.mrb[19].mxu1  ;;  %v991_v60 = vld [vmem:[#allocation2 + $0x30] sm:$0xff] (!%p1210_p2) }
 0x29e   : > { %973 = vst [vmem:[#allocation2 + $0x40] sm:$0xff] %v957_v11  ;;  %v1282_v16 = vadd.f32 %v1281_v15, %v1280_v12  ;;  %v1014_v63 = vadd.f32 (!%p1210_p2), %v1211_v47, %v991_v60 }
 0x2a0   : > { %v958_v17 = vadd.f32 %v1282_v16, %v765_v14  ;;  %v1283_v18 = vpop.f32.mrb[20].mxu1  ;;  %1030 = vst [vmem:[%s2111_s9 + $0x30] sm:$0xff] (!%p1210_p2), %v1014_v63 }
 0x2a1   : > { %v1284_v3 = vpop.f32.mrb[21].mxu1  ;;  %v992_v61 = vld [vmem:[#allocation2 + $0x38] sm:$0xff] (!%p1210_p2) }
 0x2a2   : > { %974 = vst [vmem:[#allocation2 + $0x48] sm:$0xff] %v958_v17  ;;  %v1285_v20 = vadd.f32 %v1284_v3, %v1283_v18  ;;  %v1015_v1 = vadd.f32 (!%p1210_p2), %v1211_v47, %v992_v61 }
 0x2a4   : > { %v959_v21 = vadd.f32 %v1285_v20, %v766_v19  ;;  %v1286_v23 = vpop.f32.mrb[22].mxu1  ;;  %1031 = vst [vmem:[%s2111_s9 + $0x38] sm:$0xff] (!%p1210_p2), %v1015_v1 }
 0x2a5   : > { %v1287_v25 = vpop.f32.mrb[23].mxu1  ;;  %v993_v2 = vld [vmem:[#allocation2 + $0x40] sm:$0xff] (!%p1210_p2) }
 0x2a6   : > { %975 = vst [vmem:[#allocation2 + $0x50] sm:$0xff] %v959_v21  ;;  %v1288_v26 = vadd.f32 %v1287_v25, %v1286_v23  ;;  %v1016_v5 = vadd.f32 (!%p1210_p2), %v1211_v47, %v993_v2 }
 0x2a8   : > { %v960_v27 = vadd.f32 %v1288_v26, %v767_v24  ;;  %v1289_v28 = vpop.f32.mrb[24].mxu1  ;;  %1032 = vst [vmem:[%s2111_s9 + $0x40] sm:$0xff] (!%p1210_p2), %v1016_v5 }
 0x2a9   : > { %v1290_v29 = vpop.f32.mrb[25].mxu1  ;;  %v994_v4 = vld [vmem:[#allocation2 + $0x48] sm:$0xff] (!%p1210_p2) }
 0x2aa   : > { %976 = vst [vmem:[#allocation2 + $0x58] sm:$0xff] %v960_v27  ;;  %v1291_v8 = vadd.f32 %v1290_v29, %v1289_v28  ;;  %v1017_v55 = vadd.f32 (!%p1210_p2), %v1211_v47, %v994_v4 }
 0x2ac   : > { %v961_v30 = vadd.f32 %v1291_v8, %v768_v13  ;;  %v1292_v31 = vpop.f32.mrb[26].mxu1  ;;  %1033 = vst [vmem:[%s2111_s9 + $0x48] sm:$0xff] (!%p1210_p2), %v1017_v55 }
 0x2ad   : > { %v1293_v33 = vpop.f32.mrb[27].mxu1  ;;  %v995_v0 = vld [vmem:[#allocation2 + $0x50] sm:$0xff] (!%p1210_p2) }
 0x2ae   : > { %977 = vst [vmem:[#allocation2 + $0x60] sm:$0xff] %v961_v30  ;;  %v1294_v35 = vadd.f32 %v1293_v33, %v1292_v31  ;;  %v1018_v51 = vadd.f32 (!%p1210_p2), %v1211_v47, %v995_v0 }
 0x2b0   : > { %v962_v34 = vadd.f32 %v1294_v35, %v769_v32  ;;  %v1295_v36 = vpop.f32.mrb[28].mxu1  ;;  %1034 = vst [vmem:[%s2111_s9 + $0x50] sm:$0xff] (!%p1210_p2), %v1018_v51 }
 0x2b1   : > { %v1296_v39 = vpop.f32.mrb[29].mxu1  ;;  %v996_v6 = vld [vmem:[#allocation2 + $0x58] sm:$0xff] (!%p1210_p2) }
 0x2b2   : > { %978 = vst [vmem:[#allocation2 + $0x68] sm:$0xff] %v962_v34  ;;  %v1297_v40 = vadd.f32 %v1296_v39, %v1295_v36  ;;  %v1019_v9 = vadd.f32 (!%p1210_p2), %v1211_v47, %v996_v6 }
 0x2b4   : > { %v963_v41 = vadd.f32 %v1297_v40, %v770_v38  ;;  %v1298_v22 = vpop.f32.mrb[30].mxu1  ;;  %984 = sbr.rel (%p1210_p2) target bundleno = 709 (0x2c5), region = 60  ;;  %1035 = vst [vmem:[%s2111_s9 + $0x58] sm:$0xff] (!%p1210_p2), %v1019_v9 }
 0x2b5   : > { %v1299_v43 = vpop.f32.mrb[31].mxu1  ;;  %v997_v56 = vld [vmem:[#allocation2 + $0x60] sm:$0xff] (!%p1210_p2) }
 0x2b6   : > { %979 = vst [vmem:[#allocation2 + $0x70] sm:$0xff] %v963_v41  ;;  %v1300_v44 = vadd.f32 %v1299_v43, %v1298_v22  ;;  %v1020_v10 = vadd.f32 (!%p1210_p2), %v1211_v47, %v997_v56 }
 0x2b8   : > { %v964_v45 = vadd.f32 %v1300_v44, %v771_v42  ;;  %1036 = vst [vmem:[%s2111_s9 + $0x60] sm:$0xff] (!%p1210_p2), %v1020_v10 }
 0x2b9   : > { %v998_v7 = vld [vmem:[#allocation2 + $0x68] sm:$0xff] (!%p1210_p2) }
 0x2ba   : > { %980 = vst [vmem:[#allocation2 + $0x78] sm:$0xff] %v964_v45  ;;  %v1021_v11 = vadd.f32 (!%p1210_p2), %v1211_v47, %v998_v7 }
 0x2bc   : > { %1037 = vst [vmem:[%s2111_s9 + $0x68] sm:$0xff] %v1021_v11 }
 0x2bd   : > { %v999_v12 = vld [vmem:[#allocation2 + $0x70] sm:$0xff] }
 0x2be   : > { %v1022_v15 = vadd.f32 %v1211_v47, %v999_v12 }
 0x2c0   : > { %1038 = vst [vmem:[%s2111_s9 + $0x70] sm:$0xff] %v1022_v15 }
 0x2c1   : > { %v1000_v14 = vld [vmem:[#allocation2 + $0x78] sm:$0xff] }
 0x2c2   : > { %v1023_v16 = vadd.f32 %v1211_v47, %v1000_v14 }
 0x2c4   : > { %1039 = vst [vmem:[%s2111_s9 + $0x78] sm:$0xff] %v1023_v16 }
 0x2c5 PF: > { %s2470_s24 = sld [smem:[#allocation15_spill]]  ;;  %s1054_s8 = sshll.u32 %s2111_s9, 4  ;;  %s2358_s8 = int_to_ptr.vmem [resolvable:$true] %s1054_s8 }
 0x2c6   : > { %s2471_s7 = sld [smem:[#allocation23_spill]]  ;;  %s1041_s23 = scalar_lea.sflag [#allocation5], %s2084_s20 }
 0x2c7   : > { %s1640_s4 = scalar_lea.vmem %s2358_s8, 2048  ;;  %p2472_p11 = scmp.ne.s32.totalorder %s2459_s14, 0 }
 0x2c8   : > { %p1641_p13 = scmp.ne.s32.totalorder %s2358_s8, %s1640_s4  ;;  %s1778_s15 = smov [#allocation9]  }
 0x2c9   : > { %s1644_s30 = sshll.u32 %s1778_s15, 4  ;;  %s1645_s30 = int_to_ptr.vmem [resolvable:$false] %s1644_s30 }
 0x2ca   : > { %p1642_p6 = pnand %p1641_p13, %p2472_p11  ;;  %s1646_s13 = scalar_lea.vmem %s1645_s30, 4096 }
 0x2cb   : > { %s1220_s27 = sshll.u32 %s2470_s24, 11  ;;  %p1647_p1 = scmp.lt.s32.totalorder %s2358_s8, %s1645_s30 }
 0x2cc   : > { %s2355_s6 = scalar_lea.hbm %s2471_s7, %s1220_s27  ;;  %p1643_p5 = pneg %p1642_p6 }
 0x2cd   : > { %p1648_p0 = scmp.lt.s32.totalorder %s1646_s13, %s1640_s4 }
 0x2cf   : > { %p1649_p9 = por %p1648_p0, %p1647_p1 }
 0x2d1   : > { %p1650_p12 = pnand %p1649_p9, %p1643_p5 }
 0x2d3   : > { %1653 = shalt.err (!%p1650_p12)
}
 0x2d4   : > { %s1654_s12 = scalar_lea.hbm %s2355_s6, 2048  ;;  %s1658_s17 = scalar_lea.hbm %s2471_s7, 4096 }
 0x2d5   : > { %p1655_p3 = scmp.ne.s32.totalorder %s2355_s6, %s1654_s12  ;;  %p1659_p8 = scmp.lt.u32.totalorder %s2355_s6, %s2471_s7 }
 0x2d6   : > { %p1660_p10 = scmp.lt.u32.totalorder %s1658_s17, %s1654_s12  ;;  %p1662_p13 = scmp.lt.u32.totalorder %s1654_s12, %s2355_s6 }
 0x2d7   : > { %p1656_p4 = pnand %p1655_p3, %p2472_p11 }
 0x2d8   : > { %p1661_p2 = por %p1660_p10, %p1659_p8 }
 0x2d9   : > { %p1657_p7 = pneg %p1656_p4 }
 0x2da   : > { %p1663_p6 = por %p1662_p13, %p1661_p2 }
 0x2dc   : > { %p1664_p5 = pnand %p1663_p6, %p1657_p7 }
 0x2de   : > { %1667 = shalt.err (!%p1664_p5)
}
 0x2df   : > { %s1779_s16 = smov 128   ;;  %s1780_s18 = smov 8  }
 0x2e0   : > { %1371 = dma.vmem_to_hbm [thread:$0]  (%p2472_p11), %s2358_s8, 2048, %s2355_s6, %s1041_s23, %s1779_s16, %s1779_s16, %s1780_s18  }
 0x2e1 PF: > { %p1388_p1 = scmp.ge.s32.totalorder %s1766_s28, 2  ;;  %s1069_s24 = sand.u32 1, %s1738_s21  }
 0x2e2   : > { %p2473_p0 = scmp.ne.s32.totalorder %s2461_s5, 0  ;;  %s1070_s27 = scalar_lea.sflag [#allocation5], %s1069_s24 }
 0x2e4   : > { %p1384_p9 = pnand %p1388_p1, %p2473_p0 }
 0x2e6   : > { %1721 = dma.done.wait (!%p1384_p9), %s1070_s27, 2048  }
 0x2e7   : > { %1723 = vsyncadd (!%p1384_p9), %s1070_s27, 4294965248  ;;  %s24_s28 = sadd.s32 1, %s1766_s28   ;;  %s2474_s11 = sld [smem:[#allocation13_spill]] }
 0x2e8   : > { %p21_p12 = scmp.ge.s32.totalorder %s24_s28, 6   ;;  %s2475_s20 = sld [smem:[#allocation18_spill]] }
 0x2e9   : > { %s2476_s14 = sld [smem:[#allocation14_spill]]  ;;  %s2477_s23 = sld [smem:[#allocation20_spill]] }
 0x2ea   : > { %s2478_s25 = sld [smem:[#allocation16_spill]]  ;;  %s2479_s29 = sld [smem:[#allocation17_spill]] }
 0x2eb   : > { %s2480_s27 = sld [smem:[#allocation19_spill]]  ;;  %s2481_s18 = smov %s1730_s19 }
 0x2ec   : > { %s2483_s21 = smov %s1742_s22  ;;  %s2485_s24 = smov %s1758_s26 }
 0x2ed   : > { %s2482_s19 = smov %s2474_s11  ;;  %23 = sbr.rel (!%p21_p12) target bundleno = 15 (0xf), region = 120 }
 0x2ef   : > { %s2484_s22 = smov %s2476_s14 }
 0x2f0   : > { %s2486_s26 = smov %s2479_s29 }
 0x2f4   :  { %1075 = vsyncpa [#allocation4], 1 }
 0x2f5   :  { %1077 = vsyncpa [#allocation4 + $0x1], 1 }
 0x2f6   :  { %1078 = vsyncpa [#allocation7], 1 }
 0x2f7   :  { %1080 = vsyncpa [#allocation7 + $0x1], 1 }
 0x2f8   :  { %1081 = vsyncpa [#allocation5], 1 }
 0x2f9   :  { %1083 = vsyncpa [#allocation5 + $0x1], 1 }

</bundles_post_ra>
